<compile_context>
chip_gen: v6e
topology: v6e:2x2x1
jax: 0.10.0
libtpu: 0.0.40
codegen_flags: <defaults>
</compile_context>

<pallas_src>
import functools

import jax
import jax.numpy as jnp
from jax import lax
from jax.experimental import pallas as pl
from jax.experimental.pallas import tpu as pltpu


def _lrelu(v, slope):
    return jnp.where(v > 0, v, slope * v)


def resblock_kernel(x_ref, m1_ref, b1_ref, m2_ref, b2_ref, o_ref, *,
                    slope, img_h):
    """One grid step: B image-groups of (img_h, L) lane-dense rows each.

    x_ref : (B, img_h, L)   L = lane_pack * W * C  (conv input AND identity)
    m1_ref: (3*L,  Lm) bf16 conv1 fused banded weights ([up; mid; dn] along K)
    b1_ref: (1, Lm)    f32
    m2_ref: (3*Lm, L)  bf16 conv2 fused banded weights
    b2_ref: (1, L)     f32
    o_ref : (B, img_h, L)
    """
    bg, hh, l = x_ref.shape
    rows = bg * hh
    x = x_ref[...].reshape(rows, l).astype(jnp.float32)

    # Row masks: after the +/-1 row roll, zero the rows that wrapped across an
    # image boundary.  Masking the shifted *activations* implements the conv's
    # SAME zero padding along H exactly (W padding is baked into the banded
    # weights; lane packing is block-diagonal so images never mix).
    row = lax.broadcasted_iota(jnp.int32, (rows, l), 0)
    top = (row % img_h) == 0            # shifted-in row above is padding
    bot = (row % img_h) == img_h - 1    # shifted-in row below is padding

    def conv3x3(a, m_ref, b_ref):
        # a: (rows, La) f32 activations.  Build the fused LHS [up | mid | dn]
        # in bf16 and do ONE MXU dot with f32 accumulation.
        up = jnp.where(top, 0.0, pltpu.roll(a, shift=1, axis=0))
        dn = jnp.where(bot, 0.0, pltpu.roll(a, shift=rows - 1, axis=0))  # == -1
        lhs = jnp.concatenate(
            [up.astype(jnp.bfloat16), a.astype(jnp.bfloat16),
             dn.astype(jnp.bfloat16)], axis=1)
        acc = jnp.dot(lhs, m_ref[...], preferred_element_type=jnp.float32)
        return acc + b_ref[...].astype(jnp.float32)

    a = _lrelu(x, slope)                               # first_layer
    h1 = _lrelu(conv3x3(a, m1_ref, b1_ref), slope)     # conv1 + relu
    h2 = conv3x3(h1, m2_ref, b2_ref)                   # conv2

    # last_layer = Identity; residual add, lane-dense (>=128) unmasked store.
    o_ref[...] = (x + h2).reshape(bg, hh, l).astype(o_ref.dtype)


def _fused_banded_mats(w_hwio, width, pack):
    """Fold (kw, Cin) into banded per-dh matrices, make them block-diagonal
    over `pack` lane-packed images, and stack the 3 kh taps along K.

    w_hwio: (3, 3, Cin, Cout) -> (3 * pack*width*Cin, pack*width*Cout) with
    M[dh-block][p*W*Cin + wp*Cin + ci, p*W*Cout + w*Cout + co]
        = w[dh, wp - w + 1, ci, co]   for |wp - w| <= 1 (zero otherwise).
    """
    kh, kw, cin, cout = w_hwio.shape
    eye_p = jnp.eye(pack, dtype=w_hwio.dtype)
    mats = []
    for dh in range(kh):
        m = jnp.zeros((width * cin, width * cout), w_hwio.dtype)
        for dw in range(kw):
            sel = jnp.eye(width, k=1 - dw, dtype=w_hwio.dtype)
            m = m + jnp.kron(sel, w_hwio[dh, dw])
        mats.append(jnp.kron(eye_p, m))          # block-diag over packed images
    return jnp.concatenate(mats, axis=0)         # stack kh taps along K


def _pick_groups_per_step(n_groups, img_h):
    """Batch groups per step: target M = B*H >= 128 rows, keep >=2 grid steps
    when possible (v7x megacore), else one fat step (v5e/v6e per-step cost)."""
    divs = [b for b in range(1, n_groups + 1) if n_groups % b == 0]
    good = [b for b in divs if b * img_h >= 128 and n_groups // b >= 2]
    if good:
        return min(good)
    fat = [b for b in divs if b * img_h <= 512]
    return max(fat) if fat else 1


def resblock_pallas(x_nchw, w1, b1, w2, b2, slope=0.01):
    """x_nchw: (N, C, H, W); w1: (3,3,C,Cm) HWIO; w2: (3,3,Cm,C) HWIO."""
    N, C, H, W = x_nchw.shape
    Cm = w1.shape[3]
    WC, WCm = W * C, W * Cm

    # Lane-pack P images side by side so store width / matmul N is >= 128.
    P = 1
    want = max(pl.cdiv(128, WC), pl.cdiv(128, WCm))
    for p in range(min(want, N), 0, -1):
        if N % p == 0:
            P = p
            break
    G = N // P
    L, Lm = P * WC, P * WCm
    Bg = _pick_groups_per_step(G, H)

    # NCHW -> NHWC -> (N, H, W*C) -> pack P images along lanes -> (G, H, L).
    # TODO(synk): at production sizes keep surrounding layers in this
    # lane-dense layout so these transposes (full HBM passes) amortize across
    # the ResBlock stack instead of being paid per block.
    x = jnp.transpose(x_nchw, (0, 2, 3, 1)).reshape(N, H, WC)
    x = x.reshape(G, P, H, WC).transpose(0, 2, 1, 3).reshape(G, H, L)

    # Fused banded weights as bf16 MXU inputs (f32 accumulation in kernel).
    m1 = _fused_banded_mats(w1, W, P).astype(jnp.bfloat16)    # (3L,  Lm)
    m2 = _fused_banded_mats(w2, W, P).astype(jnp.bfloat16)    # (3Lm, L)
    b1t = jnp.tile(b1, P * W).reshape(1, Lm).astype(jnp.float32)
    b2t = jnp.tile(b2, P * W).reshape(1, L).astype(jnp.float32)

    # TODO(synk): real video-net sizes (large W, C) need W-tiling with a
    # 1-column halo (banded matrices per W-tile, density 3/W_tile) plus an
    # explicit vmem_limit_bytes; otherwise weights scale as W^2 and outgrow
    # v7x's 64 MiB VMEM long before v5e/v6e's 128 MiB.
    def const_spec(shape):   # grid-invariant operands: fetch once, 1 buffer
        return pl.BlockSpec(shape, lambda i: (0,) * len(shape),
                            pipeline_mode=pl.Buffered(1))

    out = pl.pallas_call(
        functools.partial(resblock_kernel, slope=slope, img_h=H),
        out_shape=jax.ShapeDtypeStruct((G, H, L), x.dtype),
        grid=(G // Bg,),
        in_specs=[
            pl.BlockSpec((Bg, H, L), lambda i: (i, 0, 0)),
            const_spec((3 * L, Lm)),
            const_spec((1, Lm)),
            const_spec((3 * Lm, L)),
            const_spec((1, L)),
        ],
        out_specs=pl.BlockSpec((Bg, H, L), lambda i: (i, 0, 0)),
        compiler_params=pltpu.CompilerParams(
            dimension_semantics=("parallel",)),
    )(x, m1, b1t, m2, b2t)

    # (G, H, L) -> unpack lanes -> NHWC -> NCHW.
    out = out.reshape(G, H, P, WC).transpose(0, 2, 1, 3).reshape(N, H, W, C)
    return jnp.transpose(out, (0, 3, 1, 2))


def resblock_ref(x_nchw, w1, b1, w2, b2, slope=0.01):
    """Pure-JAX f32 reference (NHWC convs) for validation."""
    x = jnp.transpose(x_nchw, (0, 2, 3, 1))

    def lrelu(v):
        return jnp.where(v > 0, v, slope * v)

    dn = ("NHWC", "HWIO", "NHWC")
    out = lrelu(x)
    out = lax.conv_general_dilated(out, w1, (1, 1), "SAME",
                                   dimension_numbers=dn) + b1
    out = lrelu(out)
    out = lax.conv_general_dilated(out, w2, (1, 1), "SAME",
                                   dimension_numbers=dn) + b2
    return jnp.transpose(x + out, (0, 3, 1, 2))


if __name__ == "__main__":
    # ResBlock(channel=4) with default args: bottleneck=False -> in_channel=4.
    channel = 4
    in_channel = channel          # bottleneck=False
    # Batch chosen so the kernel gets M = 128 rows/step AND 2 grid steps
    # (v7x megacore); data is still tiny (32*4*16*16 f32 = 128 KiB).
    N, H, W = 32, 16, 16

    key = jax.random.PRNGKey(0)
    kx, k1, k2, k3, k4 = jax.random.split(key, 5)

    x = jax.random.normal(kx, (N, channel, H, W), jnp.float32)
    # conv weights in HWIO (kh, kw, in, out); deterministic synthetic init.
    w1 = 0.1 * jax.random.normal(k1, (3, 3, channel, in_channel), jnp.float32)
    b1 = 0.1 * jax.random.normal(k2, (in_channel,), jnp.float32)
    w2 = 0.1 * jax.random.normal(k3, (3, 3, in_channel, channel), jnp.float32)
    b2 = 0.1 * jax.random.normal(k4, (channel,), jnp.float32)

    out = jax.jit(resblock_pallas)(x, w1, b1, w2, b2)
    out = jax.block_until_ready(out)

    ref = resblock_ref(x, w1, b1, w2, b2)
    assert out.shape == x.shape
    # bf16 MXU inputs with f32 accumulation -> looser tolerance than pure f32.
    err = float(jnp.max(jnp.abs(out - ref)))
    assert jnp.allclose(out, ref, rtol=1e-2, atol=2e-2), err

    print("KERNEL_OK")
</pallas_src>

<mosaic_0001>
module attributes {stable_mosaic.version = 11 : i64} {
  func.func @resblock_kernel(%arg0: i32, %arg1: memref<8x16x128xf32, #tpu.memory_space<vmem>>, %arg2: memref<384x128xbf16, #tpu.memory_space<vmem>>, %arg3: memref<1x128xf32, #tpu.memory_space<vmem>>, %arg4: memref<384x128xbf16, #tpu.memory_space<vmem>>, %arg5: memref<1x128xf32, #tpu.memory_space<vmem>>, %arg6: memref<8x16x128xf32, #tpu.memory_space<vmem>>) attributes {dimension_semantics = [#tpu.dimension_semantics<parallel>], iteration_bounds = array<i64: 2>, scalar_prefetch = 0 : i64, scratch_operands = 0 : i64, tpu.core_type = #tpu.core_type<tc>, window_params = [{transform_indices = @transform_0, window_bounds = array<i64: 8, 16, 128>}, {pipeline_mode = #tpu.pipeline_mode<synchronous>, transform_indices = @transform_1, window_bounds = array<i64: 384, 128>}, {pipeline_mode = #tpu.pipeline_mode<synchronous>, transform_indices = @transform_2, window_bounds = array<i64: 1, 128>}, {pipeline_mode = #tpu.pipeline_mode<synchronous>, transform_indices = @transform_3, window_bounds = array<i64: 384, 128>}, {pipeline_mode = #tpu.pipeline_mode<synchronous>, transform_indices = @transform_4, window_bounds = array<i64: 1, 128>}, {transform_indices = @transform_5, window_bounds = array<i64: 8, 16, 128>}]} {
    %c0 = arith.constant 0 : index
    %c0_0 = arith.constant 0 : index
    %c0_1 = arith.constant 0 : index
    %0 = vector.load %arg1[%c0, %c0_0, %c0_1] : memref<8x16x128xf32, #tpu.memory_space<vmem>>, vector<8x16x128xf32>
    %1 = vector.shape_cast %0 : vector<8x16x128xf32> to vector<128x128xf32>
    %2 = tpu.iota {dimensions = array<i32: 0>} : vector<128x128xi32>
    %c16_i32 = arith.constant 16 : i32
    %c0_i32 = arith.constant 0 : i32
    %3 = arith.cmpi eq, %c16_i32, %c0_i32 : i32
    %c1_i32 = arith.constant 1 : i32
    %4 = arith.select %3, %c1_i32, %c16_i32 : i32
    %5 = vector.broadcast %4 : i32 to vector<128x128xi32>
    %6 = arith.remsi %2, %5 : vector<128x128xi32>
    %c0_i32_2 = arith.constant 0 : i32
    %7 = vector.broadcast %c0_i32_2 : i32 to vector<128x128xi32>
    %8 = arith.cmpi ne, %6, %7 : vector<128x128xi32>
    %c0_i32_3 = arith.constant 0 : i32
    %9 = vector.broadcast %c0_i32_3 : i32 to vector<128x128xi32>
    %10 = arith.cmpi slt, %6, %9 : vector<128x128xi32>
    %c0_i32_4 = arith.constant 0 : i32
    %11 = arith.cmpi slt, %4, %c0_i32_4 : i32
    %12 = vector.broadcast %11 : i1 to vector<128x128xi1>
    %13 = vector.broadcast %12 : vector<128x128xi1> to vector<128x128xi1>
    %14 = arith.xori %10, %13 : vector<128x128xi1>
    %15 = arith.andi %14, %8 : vector<128x128xi1>
    %16 = vector.broadcast %4 : i32 to vector<128x128xi32>
    %17 = arith.addi %6, %16 : vector<128x128xi32>
    %18 = arith.select %15, %17, %6 : vector<128x128xi1>, vector<128x128xi32>
    %c0_i32_5 = arith.constant 0 : i32
    %19 = vector.broadcast %c0_i32_5 : i32 to vector<128x128xi32>
    %20 = arith.cmpi eq, %18, %19 : vector<128x128xi32>
    %c16_i32_6 = arith.constant 16 : i32
    %c0_i32_7 = arith.constant 0 : i32
    %21 = arith.cmpi eq, %c16_i32_6, %c0_i32_7 : i32
    %c1_i32_8 = arith.constant 1 : i32
    %22 = arith.select %21, %c1_i32_8, %c16_i32_6 : i32
    %23 = vector.broadcast %22 : i32 to vector<128x128xi32>
    %24 = arith.remsi %2, %23 : vector<128x128xi32>
    %c0_i32_9 = arith.constant 0 : i32
    %25 = vector.broadcast %c0_i32_9 : i32 to vector<128x128xi32>
    %26 = arith.cmpi ne, %24, %25 : vector<128x128xi32>
    %c0_i32_10 = arith.constant 0 : i32
    %27 = vector.broadcast %c0_i32_10 : i32 to vector<128x128xi32>
    %28 = arith.cmpi slt, %24, %27 : vector<128x128xi32>
    %c0_i32_11 = arith.constant 0 : i32
    %29 = arith.cmpi slt, %22, %c0_i32_11 : i32
    %30 = vector.broadcast %29 : i1 to vector<128x128xi1>
    %31 = vector.broadcast %30 : vector<128x128xi1> to vector<128x128xi1>
    %32 = arith.xori %28, %31 : vector<128x128xi1>
    %33 = arith.andi %32, %26 : vector<128x128xi1>
    %34 = vector.broadcast %22 : i32 to vector<128x128xi32>
    %35 = arith.addi %24, %34 : vector<128x128xi32>
    %36 = arith.select %33, %35, %24 : vector<128x128xi1>, vector<128x128xi32>
    %c15_i32 = arith.constant 15 : i32
    %37 = vector.broadcast %c15_i32 : i32 to vector<128x128xi32>
    %38 = arith.cmpi eq, %36, %37 : vector<128x128xi32>
    %cst = arith.constant 0.000000e+00 : f32
    %39 = vector.broadcast %cst : f32 to vector<128x128xf32>
    %40 = arith.cmpf ogt, %1, %39 : vector<128x128xf32>
    %cst_12 = arith.constant 0.00999999977 : f32
    %41 = vector.broadcast %cst_12 : f32 to vector<128x128xf32>
    %42 = arith.mulf %41, %1 : vector<128x128xf32>
    %43 = arith.select %40, %1, %42 : vector<128x128xi1>, vector<128x128xf32>
    %c1_i32_13 = arith.constant 1 : i32
    %44 = tpu.dynamic_rotate %43 by %c1_i32_13 dim 0 : vector<128x128xf32>, i32 -> vector<128x128xf32>
    %cst_14 = arith.constant 0.000000e+00 : f32
    %45 = vector.broadcast %cst_14 : f32 to vector<128x128xf32>
    %46 = arith.select %20, %45, %44 : vector<128x128xi1>, vector<128x128xf32>
    %c127_i32 = arith.constant 127 : i32
    %47 = tpu.dynamic_rotate %43 by %c127_i32 dim 0 : vector<128x128xf32>, i32 -> vector<128x128xf32>
    %cst_15 = arith.constant 0.000000e+00 : f32
    %48 = vector.broadcast %cst_15 : f32 to vector<128x128xf32>
    %49 = arith.select %38, %48, %47 : vector<128x128xi1>, vector<128x128xf32>
    %50 = arith.truncf %46 : vector<128x128xf32> to vector<128x128xbf16>
    %51 = arith.truncf %43 : vector<128x128xf32> to vector<128x128xbf16>
    %52 = arith.truncf %49 : vector<128x128xf32> to vector<128x128xbf16>
    %53 = tpu.concatenate %50, %51, %52 in 1 : vector<128x128xbf16>, vector<128x128xbf16>, vector<128x128xbf16> -> vector<128x384xbf16>
    %c0_16 = arith.constant 0 : index
    %c0_17 = arith.constant 0 : index
    %54 = vector.load %arg2[%c0_16, %c0_17] : memref<384x128xbf16, #tpu.memory_space<vmem>>, vector<384x128xbf16>
    %cst_18 = arith.constant dense<0.000000e+00> : vector<128x128xf32>
    %55 = tpu.matmul %53, %54, %cst_18 {dimension_numbers = #tpu.dot_dimension_numbers<[1], [0], [0], [1], [0, 0, 1, 1], [], []>} : vector<128x384xbf16>, vector<384x128xbf16>, vector<128x128xf32> -> vector<128x128xf32>
    %c0_19 = arith.constant 0 : index
    %c0_20 = arith.constant 0 : index
    %56 = vector.load %arg3[%c0_19, %c0_20] : memref<1x128xf32, #tpu.memory_space<vmem>>, vector<1x128xf32>
    %57 = vector.broadcast %56 : vector<1x128xf32> to vector<128x128xf32>
    %58 = arith.addf %55, %57 : vector<128x128xf32>
    %cst_21 = arith.constant 0.000000e+00 : f32
    %59 = vector.broadcast %cst_21 : f32 to vector<128x128xf32>
    %60 = arith.cmpf ogt, %58, %59 : vector<128x128xf32>
    %cst_22 = arith.constant 0.00999999977 : f32
    %61 = vector.broadcast %cst_22 : f32 to vector<128x128xf32>
    %62 = arith.mulf %61, %58 : vector<128x128xf32>
    %63 = arith.select %60, %58, %62 : vector<128x128xi1>, vector<128x128xf32>
    %c1_i32_23 = arith.constant 1 : i32
    %64 = tpu.dynamic_rotate %63 by %c1_i32_23 dim 0 : vector<128x128xf32>, i32 -> vector<128x128xf32>
    %cst_24 = arith.constant 0.000000e+00 : f32
    %65 = vector.broadcast %cst_24 : f32 to vector<128x128xf32>
    %66 = arith.select %20, %65, %64 : vector<128x128xi1>, vector<128x128xf32>
    %c127_i32_25 = arith.constant 127 : i32
    %67 = tpu.dynamic_rotate %63 by %c127_i32_25 dim 0 : vector<128x128xf32>, i32 -> vector<128x128xf32>
    %cst_26 = arith.constant 0.000000e+00 : f32
    %68 = vector.broadcast %cst_26 : f32 to vector<128x128xf32>
    %69 = arith.select %38, %68, %67 : vector<128x128xi1>, vector<128x128xf32>
    %70 = arith.truncf %66 : vector<128x128xf32> to vector<128x128xbf16>
    %71 = arith.truncf %63 : vector<128x128xf32> to vector<128x128xbf16>
    %72 = arith.truncf %69 : vector<128x128xf32> to vector<128x128xbf16>
    %73 = tpu.concatenate %70, %71, %72 in 1 : vector<128x128xbf16>, vector<128x128xbf16>, vector<128x128xbf16> -> vector<128x384xbf16>
    %c0_27 = arith.constant 0 : index
    %c0_28 = arith.constant 0 : index
    %74 = vector.load %arg4[%c0_27, %c0_28] : memref<384x128xbf16, #tpu.memory_space<vmem>>, vector<384x128xbf16>
    %cst_29 = arith.constant dense<0.000000e+00> : vector<128x128xf32>
    %75 = tpu.matmul %73, %74, %cst_29 {dimension_numbers = #tpu.dot_dimension_numbers<[1], [0], [0], [1], [0, 0, 1, 1], [], []>} : vector<128x384xbf16>, vector<384x128xbf16>, vector<128x128xf32> -> vector<128x128xf32>
    %c0_30 = arith.constant 0 : index
    %c0_31 = arith.constant 0 : index
    %76 = vector.load %arg5[%c0_30, %c0_31] : memref<1x128xf32, #tpu.memory_space<vmem>>, vector<1x128xf32>
    %77 = vector.broadcast %76 : vector<1x128xf32> to vector<128x128xf32>
    %78 = arith.addf %75, %77 : vector<128x128xf32>
    %79 = arith.addf %1, %78 : vector<128x128xf32>
    %80 = vector.shape_cast %79 : vector<128x128xf32> to vector<8x16x128xf32>
    %c0_32 = arith.constant 0 : index
    %c0_33 = arith.constant 0 : index
    %c0_34 = arith.constant 0 : index
    %81 = vector.load %arg6[%c0_32, %c0_33, %c0_34] : memref<8x16x128xf32, #tpu.memory_space<vmem>>, vector<8x16x128xf32>
    tpu.vector_store %arg6[%c0_32, %c0_33, %c0_34], %80 {strides = array<i32>} : memref<8x16x128xf32, #tpu.memory_space<vmem>>, vector<8x16x128xf32>,
    return
  }
  func.func @transform_0(%arg0: i32) -> (i32, i32, i32) {
    %c0_i32 = arith.constant 0 : i32
    %c0_i32_0 = arith.constant 0 : i32
    %c0_i32_1 = arith.constant 0 : i32
    return %arg0, %c0_i32, %c0_i32_0 : i32, i32, i32
  }
  func.func @transform_1(%arg0: i32) -> (i32, i32) {
    %c0_i32 = arith.constant 0 : i32
    %c0_i32_0 = arith.constant 0 : i32
    %c0_i32_1 = arith.constant 0 : i32
    return %c0_i32, %c0_i32_0 : i32, i32
  }
  func.func @transform_2(%arg0: i32) -> (i32, i32) {
    %c0_i32 = arith.constant 0 : i32
    %c0_i32_0 = arith.constant 0 : i32
    %c0_i32_1 = arith.constant 0 : i32
    return %c0_i32, %c0_i32_0 : i32, i32
  }
  func.func @transform_3(%arg0: i32) -> (i32, i32) {
    %c0_i32 = arith.constant 0 : i32
    %c0_i32_0 = arith.constant 0 : i32
    %c0_i32_1 = arith.constant 0 : i32
    return %c0_i32, %c0_i32_0 : i32, i32
  }
  func.func @transform_4(%arg0: i32) -> (i32, i32) {
    %c0_i32 = arith.constant 0 : i32
    %c0_i32_0 = arith.constant 0 : i32
    %c0_i32_1 = arith.constant 0 : i32
    return %c0_i32, %c0_i32_0 : i32, i32
  }
  func.func @transform_5(%arg0: i32) -> (i32, i32, i32) {
    %c0_i32 = arith.constant 0 : i32
    %c0_i32_0 = arith.constant 0 : i32
    %c0_i32_1 = arith.constant 0 : i32
    return %arg0, %c0_i32, %c0_i32_0 : i32, i32, i32
  }
}

</mosaic_0001>

<bundles_post_ra>
// kernel: tile.13
= control target key start
LH: loop header
LB: loop body
LE: loop exit
PB: predicated region body
PF: predicated region fallthrough
CT: control target
= control target key end

     0   :  { %s40_s0 = inlined_call_operand.vmem [shape: f32[4], index: 0, kind: input, shape index: {}]   ;;  %s41_s1 = inlined_call_operand.vmem [shape: f32[32,4], index: 1, kind: output, shape index: {}]  }
   0x1   :  { %v4_v0 = vld [vmem:[%s40_s0] ss:$0 sm:$0xff] }
   0x2   :  { %5 = vst [vmem:[%s41_s1] sm:$0xff] %v4_v0  ;;  %12 = vst [vmem:[%s41_s1 + $0x8] sm:$0xff] %v4_v0 }
   0x3   :  { %13 = vst [vmem:[%s41_s1 + $0x10] sm:$0xff] %v4_v0  ;;  %14 = vst [vmem:[%s41_s1 + $0x18] sm:$0xff] %v4_v0 }

// kernel: tile.14
= control target key start
LH: loop header
LB: loop body
LE: loop exit
PB: predicated region body
PF: predicated region fallthrough
CT: control target
= control target key end

     0   :  { %s261_s10 = smov 124   ;;  %s262_s11 = smov 116   ;;  %vm3_vm0 = vcmask 31744   ;;  %vm9_vm1 = vcmask 1048544   ;;  %vm15_vm2 = vcmask 1015744   ;;  %vm21_vm3 = vcmask 982944   ;;  %s401_s0 = inlined_call_operand.vmem [shape: f32[32,4], index: 0, kind: input, shape index: {}]   ;;  %s402_s1 = inlined_call_operand.vmem [shape: f32[1,128], index: 1, kind: output, shape index: {}]  }
   0x1   :  { %v199_v0 = vld [vmem:[%s401_s0 + $0x1f] sm:$0x1]   ;;  %v201_v1 = vld [vmem:[%s401_s0 + $0x1d] sm:$0x1]   ;;  %v200_v2 = vld [vmem:[%s401_s0 + $0x1e] sm:$0x1]  }
   0x2   :  { %7 = vrot.lane.b32.xlu0 %v199_v0, %s261_s10  ;;  %19 = vrot.lane.b32.xlu1 %v201_v1, %s262_s11  ;;  %v202_v3 = vld [vmem:[%s401_s0 + $0x1c] sm:$0x1]   ;;  %s263_s16 = smov 120   ;;  %s264_s17 = smov 112   ;;  %v203_v4 = vld [vmem:[%s401_s0 + $0x1b] sm:$0x1]  }
   0x3   :  { %v204_v5 = vld [vmem:[%s401_s0 + $0x1a] sm:$0x1]   ;;  %s265_s22 = smov 108   ;;  %s266_s23 = smov 104   ;;  %v205_v6 = vld [vmem:[%s401_s0 + $0x19] sm:$0x1]  }
   0x4   :  { %v206_v7 = vld [vmem:[%s401_s0 + $0x18] sm:$0x1]   ;;  %s267_s28 = smov 100   ;;  %s268_s29 = smov 96   ;;  %v207_v8 = vld [vmem:[%s401_s0 + $0x17] sm:$0x1]  }
   0x5   :  { %v208_v9 = vld [vmem:[%s401_s0 + $0x16] sm:$0x1]   ;;  %v2_v10 = vld [vmem:[%s401_s0] sm:$0x1]   ;;  %s269_s7 = smov 92   ;;  %s270_s8 = smov 88  }
   0x6   :  { %13 = vrot.lane.b32.xlu0 %v200_v2, %s263_s16  ;;  %25 = vrot.lane.b32.xlu1 %v202_v3, %s264_s17  ;;  %4 = vst.msk [vmem:[#allocation0] sm:$0x1] %vm3_vm0, %v2_v10   ;;  %v209_v11 = vld [vmem:[%s401_s0 + $0x15] sm:$0x1]   ;;  %v210_v12 = vld [vmem:[%s401_s0 + $0x14] sm:$0x1]  }
   0x7   :  { %s271_s13 = smov 84   ;;  %s272_s14 = smov 80   ;;  %v211_v13 = vld [vmem:[%s401_s0 + $0x13] sm:$0x1]   ;;  %v212_v14 = vld [vmem:[%s401_s0 + $0x12] sm:$0x1]  }
   0x8   :  { %s273_s19 = smov 76   ;;  %s274_s20 = smov 72   ;;  %v213_v15 = vld [vmem:[%s401_s0 + $0x11] sm:$0x1]   ;;  %v214_v16 = vld [vmem:[%s401_s0 + $0x10] sm:$0x1]  }
   0x9   :  { %s275_s25 = smov 68   ;;  %s276_s26 = smov 64   ;;  %v215_v17 = vld [vmem:[%s401_s0 + $0xf] sm:$0x1]   ;;  %v216_v18 = vld [vmem:[%s401_s0 + $0xe] sm:$0x1]  }
   0xa   :  { %31 = vrot.lane.b32.xlu0 %v203_v4, %s265_s22  ;;  %37 = vrot.lane.b32.xlu1 %v204_v5, %s266_s23  ;;  %s277_s2 = smov 60   ;;  %s278_s3 = smov 56   ;;  %v217_v19 = vld [vmem:[%s401_s0 + $0xd] sm:$0x1]   ;;  %v218_v20 = vld [vmem:[%s401_s0 + $0xc] sm:$0x1]  }
   0xb   :  { %s280_s9 = smov 48   ;;  %v219_v21 = vld [vmem:[%s401_s0 + $0xb] sm:$0x1]   ;;  %v220_v22 = vld [vmem:[%s401_s0 + $0xa] sm:$0x1]   ;;  %s282_s15 = smov 40  }
   0xc   :  { %v221_v23 = vld [vmem:[%s401_s0 + $0x9] sm:$0x1]   ;;  %v222_v24 = vld [vmem:[%s401_s0 + $0x8] sm:$0x1]   ;;  %s284_s21 = smov 32   ;;  %s286_s27 = smov 24  }
   0xd   :  { %v223_v25 = vld [vmem:[%s401_s0 + $0x7] sm:$0x1]   ;;  %v224_v26 = vld [vmem:[%s401_s0 + $0x6] sm:$0x1]   ;;  %v225_v27 = vld [vmem:[%s401_s0 + $0x5] sm:$0x1]  }
   0xe   :  { %43 = vrot.lane.b32.xlu0 %v205_v6, %s267_s28  ;;  %49 = vrot.lane.b32.xlu1 %v206_v7, %s268_s29  ;;  %v226_v28 = vld [vmem:[%s401_s0 + $0x4] sm:$0x1]   ;;  %s288_s4 = smov 16   ;;  %v227_v29 = vld [vmem:[%s401_s0 + $0x3] sm:$0x1]   ;;  %s290_s10 = smov 8  }
   0xf   :  { %v228_v30 = vld [vmem:[%s401_s0 + $0x2] sm:$0x1]   ;;  %v229_v31 = vld [vmem:[%s401_s0 + $0x1] sm:$0x1]   ;;  %s291_s0 = smov 4   ;;  %vm27_vm4 = vcmask 950144  }
  0x10   :  { %vm33_vm5 = vcmask 917344   ;;  %vm39_vm6 = vcmask 884544   ;;  %vm45_vm7 = vcmask 851744   ;;  %vm51_vm8 = vcmask 818944  }
  0x11   :  { %vm57_vm9 = vcmask 786144   ;;  %vm63_vm10 = vcmask 753344   ;;  %vm69_vm11 = vcmask 720544   ;;  %vm75_vm12 = vcmask 687744  }
  0x12   :  { %55 = vrot.lane.b32.xlu0 %v207_v8, %s269_s7  ;;  %61 = vrot.lane.b32.xlu1 %v208_v9, %s270_s8  ;;  %s279_s8 = smov 52   ;;  %vm81_vm13 = vcmask 654944   ;;  %vm87_vm14 = vcmask 622144   ;;  %vm93_vm15 = vcmask 589344   ;;  %vm99_vm0 = vcmask 556544  }
  0x16   :  { %67 = vrot.lane.b32.xlu0 %v209_v11, %s271_s13  ;;  %73 = vrot.lane.b32.xlu1 %v210_v12, %s272_s14  ;;  %s281_s14 = smov 44  }
  0x1a   :  { %79 = vrot.lane.b32.xlu0 %v211_v13, %s273_s19  ;;  %85 = vrot.lane.b32.xlu1 %v212_v14, %s274_s20  ;;  %s283_s20 = smov 36  }
  0x1e   :  { %91 = vrot.lane.b32.xlu0 %v213_v15, %s275_s25  ;;  %97 = vrot.lane.b32.xlu1 %v214_v16, %s276_s26  ;;  %s285_s26 = smov 28  }
  0x22   :  { %103 = vrot.lane.b32.xlu0 %v215_v17, %s277_s2  ;;  %109 = vrot.lane.b32.xlu1 %v216_v18, %s278_s3  ;;  %s287_s3 = smov 20  }
  0x26   :  { %115 = vrot.lane.b32.xlu0 %v217_v19, %s279_s8  ;;  %121 = vrot.lane.b32.xlu1 %v218_v20, %s280_s9  ;;  %s289_s9 = smov 12  }
  0x2a   :  { %127 = vrot.lane.b32.xlu0 %v219_v21, %s281_s14  ;;  %133 = vrot.lane.b32.xlu1 %v220_v22, %s282_s15 }
  0x2e   :  { %139 = vrot.lane.b32.xlu0 %v221_v23, %s283_s20  ;;  %145 = vrot.lane.b32.xlu1 %v222_v24, %s284_s21 }
  0x32   :  { %151 = vrot.lane.b32.xlu0 %v223_v25, %s285_s26  ;;  %157 = vrot.lane.b32.xlu1 %v224_v26, %s286_s27 }
  0x36   :  { %163 = vrot.lane.b32.xlu0 %v225_v27, %s287_s3  ;;  %169 = vrot.lane.b32.xlu1 %v226_v28, %s288_s4 }
  0x3a   :  { %175 = vrot.lane.b32.xlu0 %v227_v29, %s289_s9  ;;  %181 = vrot.lane.b32.xlu1 %v228_v30, %s290_s10 }
  0x3e   :  { %187 = vrot.lane.b32.xlu0 %v229_v31, %s291_s0 }
  0x74   :  { %v8_v32 = vpop.permute.xlu0 %7   ;;  %v20_v33 = vpop.permute.xlu1 %19  }
  0x75   :  { %10 = vst.msk [vmem:[#allocation0] sm:$0x1] %vm9_vm1, %v8_v32   ;;  %vm105_vm1 = vcmask 523744  }
  0x78   :  { %v14_v34 = vpop.permute.xlu0 %13   ;;  %v26_v35 = vpop.permute.xlu1 %25  }
  0x79   :  { %16 = vst.msk [vmem:[#allocation0] sm:$0x1] %vm15_vm2, %v14_v34   ;;  %vm111_vm2 = vcmask 490944  }
  0x7a   :  { %22 = vst.msk [vmem:[#allocation0] sm:$0x1] %vm21_vm3, %v20_v33   ;;  %vm117_vm3 = vcmask 458144  }
  0x7b   :  { %28 = vst.msk [vmem:[#allocation0] sm:$0x1] %vm27_vm4, %v26_v35   ;;  %vm123_vm4 = vcmask 425344  }
  0x7c   :  { %v32_v36 = vpop.permute.xlu0 %31   ;;  %v38_v37 = vpop.permute.xlu1 %37  }
  0x7d   :  { %34 = vst.msk [vmem:[#allocation0] sm:$0x1] %vm33_vm5, %v32_v36   ;;  %vm129_vm5 = vcmask 392544  }
  0x7e   :  { %40 = vst.msk [vmem:[#allocation0] sm:$0x1] %vm39_vm6, %v38_v37   ;;  %vm135_vm6 = vcmask 359744  }
  0x80   :  { %v44_v38 = vpop.permute.xlu0 %43   ;;  %v50_v39 = vpop.permute.xlu1 %49  }
  0x81   :  { %46 = vst.msk [vmem:[#allocation0] sm:$0x1] %vm45_vm7, %v44_v38   ;;  %vm141_vm7 = vcmask 326944  }
  0x82   :  { %52 = vst.msk [vmem:[#allocation0] sm:$0x1] %vm51_vm8, %v50_v39   ;;  %vm147_vm8 = vcmask 294144  }
  0x84   :  { %v56_v40 = vpop.permute.xlu0 %55   ;;  %v62_v41 = vpop.permute.xlu1 %61  }
  0x85   :  { %58 = vst.msk [vmem:[#allocation0] sm:$0x1] %vm57_vm9, %v56_v40   ;;  %vm153_vm9 = vcmask 261344  }
  0x86   :  { %64 = vst.msk [vmem:[#allocation0] sm:$0x1] %vm63_vm10, %v62_v41   ;;  %vm159_vm10 = vcmask 228544  }
  0x88   :  { %v68_v42 = vpop.permute.xlu0 %67   ;;  %v74_v43 = vpop.permute.xlu1 %73  }
  0x89   :  { %70 = vst.msk [vmem:[#allocation0] sm:$0x1] %vm69_vm11, %v68_v42   ;;  %vm165_vm11 = vcmask 195744  }
  0x8a   :  { %76 = vst.msk [vmem:[#allocation0] sm:$0x1] %vm75_vm12, %v74_v43   ;;  %vm171_vm12 = vcmask 162944  }
  0x8c   :  { %v80_v44 = vpop.permute.xlu0 %79   ;;  %v86_v45 = vpop.permute.xlu1 %85  }
  0x8d   :  { %82 = vst.msk [vmem:[#allocation0] sm:$0x1] %vm81_vm13, %v80_v44   ;;  %vm177_vm13 = vcmask 130144  }
  0x8e   :  { %88 = vst.msk [vmem:[#allocation0] sm:$0x1] %vm87_vm14, %v86_v45   ;;  %vm183_vm14 = vcmask 97344  }
  0x90   :  { %v92_v46 = vpop.permute.xlu0 %91   ;;  %v98_v47 = vpop.permute.xlu1 %97  }
  0x91   :  { %94 = vst.msk [vmem:[#allocation0] sm:$0x1] %vm93_vm15, %v92_v46   ;;  %vm189_vm15 = vcmask 64544  }
  0x92   :  { %100 = vst.msk [vmem:[#allocation0] sm:$0x1] %vm99_vm0, %v98_v47  }
  0x94   :  { %v104_v48 = vpop.permute.xlu0 %103   ;;  %v110_v49 = vpop.permute.xlu1 %109  }
  0x95   :  { %106 = vst.msk [vmem:[#allocation0] sm:$0x1] %vm105_vm1, %v104_v48  }
  0x96   :  { %112 = vst.msk [vmem:[#allocation0] sm:$0x1] %vm111_vm2, %v110_v49  }
  0x98   :  { %v116_v50 = vpop.permute.xlu0 %115   ;;  %v122_v51 = vpop.permute.xlu1 %121  }
  0x99   :  { %118 = vst.msk [vmem:[#allocation0] sm:$0x1] %vm117_vm3, %v116_v50  }
  0x9a   :  { %124 = vst.msk [vmem:[#allocation0] sm:$0x1] %vm123_vm4, %v122_v51  }
  0x9c   :  { %v128_v52 = vpop.permute.xlu0 %127   ;;  %v134_v53 = vpop.permute.xlu1 %133  }
  0x9d   :  { %130 = vst.msk [vmem:[#allocation0] sm:$0x1] %vm129_vm5, %v128_v52  }
  0x9e   :  { %136 = vst.msk [vmem:[#allocation0] sm:$0x1] %vm135_vm6, %v134_v53  }
  0xa0   :  { %v140_v54 = vpop.permute.xlu0 %139   ;;  %v146_v55 = vpop.permute.xlu1 %145  }
  0xa1   :  { %142 = vst.msk [vmem:[#allocation0] sm:$0x1] %vm141_vm7, %v140_v54  }
  0xa2   :  { %148 = vst.msk [vmem:[#allocation0] sm:$0x1] %vm147_vm8, %v146_v55  }
  0xa4   :  { %v152_v56 = vpop.permute.xlu0 %151   ;;  %v158_v57 = vpop.permute.xlu1 %157  }
  0xa5   :  { %154 = vst.msk [vmem:[#allocation0] sm:$0x1] %vm153_vm9, %v152_v56  }
  0xa6   :  { %160 = vst.msk [vmem:[#allocation0] sm:$0x1] %vm159_vm10, %v158_v57  }
  0xa8   :  { %v164_v58 = vpop.permute.xlu0 %163   ;;  %v170_v59 = vpop.permute.xlu1 %169  }
  0xa9   :  { %166 = vst.msk [vmem:[#allocation0] sm:$0x1] %vm165_vm11, %v164_v58  }
  0xaa   :  { %172 = vst.msk [vmem:[#allocation0] sm:$0x1] %vm171_vm12, %v170_v59  }
  0xac   :  { %v176_v60 = vpop.permute.xlu0 %175   ;;  %v182_v61 = vpop.permute.xlu1 %181  }
  0xad   :  { %178 = vst.msk [vmem:[#allocation0] sm:$0x1] %vm177_vm13, %v176_v60  }
  0xae   :  { %184 = vst.msk [vmem:[#allocation0] sm:$0x1] %vm183_vm14, %v182_v61  }
  0xb0   :  { %v188_v62 = vpop.permute.xlu0 %187  }
  0xb1   :  { %190 = vst.msk [vmem:[#allocation0] sm:$0x1] %vm189_vm15, %v188_v62  }
  0xb8   :  { %v195_v63 = vld [vmem:[#allocation0] sm:$0x1] }
  0xb9   :  { %198 = vst [vmem:[%s402_s1] sm:$0x1] %v195_v63 }

// kernel: resblock_pallas.1
= control target key start
LH: loop header
LB: loop body
LE: loop exit
PB: predicated region body
PF: predicated region fallthrough
CT: control target
= control target key end

     0   :  { %s2250_s18 = smov 0   ;;  %s3017_s0 = inlined_call_operand.vmem [shape: f32[16,16,128], index: 0, kind: input, shape index: {}]   ;;  %s3018_s1 = inlined_call_operand.vmem [shape: bf16[384,128], index: 1, kind: input, shape index: {}]   ;;  %s3019_s2 = inlined_call_operand.vmem [shape: f32[1,128], index: 2, kind: input, shape index: {}]   ;;  %s3020_s3 = inlined_call_operand.vmem [shape: bf16[384,128], index: 3, kind: input, shape index: {}]   ;;  %s3021_s4 = inlined_call_operand.vmem [shape: f32[1,128], index: 4, kind: input, shape index: {}]   ;;  %s3022_s5 = inlined_call_operand.vmem [shape: f32[16,16,128], index: 5, kind: output, shape index: {}]  }
   0x1 LB: > { %s1705_s19 = sadd.s32 4294967295, %s2217_s18   ;;  %p1709_p0 = scmp.ge.s32.totalorder %s2217_s18, 1  ;;  %s2217_s18 = sphi %s2250_s18, %s15_s18  }
   0x2   : > { %p189_p1 = scmp.lt.s32.totalorder %s2217_s18, 3 }
   0x4   : > { %p190_p2 = pnand %p1709_p0, %p189_p1 }
   0x5   : > { %s1710_s7 = sshll.u32 (!%p190_p2), %s1705_s19, 3 }
   0x6   : > { %193 = sbr.rel (%p190_p2) target bundleno = 577 (0x241), region = 40  ;;  %p220_p3 = scmp.lt.s32.totalorder (!%p190_p2), %s1710_s7, 15 }
   0xb   : > { %v2147_v0 = vld [vmem:[%s3018_s1 + $0x78] sm:$0xff]   ;;  %v2149_v2 = vld [vmem:[%s3018_s1 + $0x70] sm:$0xff]   ;;  %v2152_v5 = vld [vmem:[%s3018_s1 + $0x68] sm:$0xff]   ;;  %v250_v6 = vlaneseq  ;;  %s3124_s7 = smov (!%p220_p3, %s1710_s7), 15  ;;  %vm2219_vm12 = vmmov 1  }
   0xc   : > { %v2148_v1 = vld [vmem:[%s3018_s1 + $0x38] sm:$0xff]   ;;  %1914 = vmatprep.subr.bf16.mxu0 %v2147_v0  ;;  %v2151_v4 = vld [vmem:[%s3018_s1 + $0x30] sm:$0xff]   ;;  %v2154_v8 = vld [vmem:[%s3018_s1 + $0x28] sm:$0xff]   ;;  %s1896_s29 = sshll.u32 %s3124_s7, 4 }
   0xd   : > { %1915 = vmatpush3.bf16.msra.mxu0 %v2148_v1  ;;  %v2150_v3 = vld [vmem:[%s3018_s1 + $0xb8] sm:$0xff]   ;;  %v2153_v7 = vld [vmem:[%s3018_s1 + $0xb0] sm:$0xff]   ;;  %v2155_v9 = vld [vmem:[%s3018_s1 + $0x60] sm:$0xff]   ;;  %v2288_v11 = vshrl.u32 %v250_v6, 7  ;;  %s2333_s14 = scalar_lea.vmem %s3017_s0, %s1896_s29  ;;  %s2965_s16 = scalar_lea.vmem %s3022_s5, %s1896_s29 }
   0xe   : > { %1916 = vmatprep.subr.bf16.mxu0 %v2149_v2  ;;  %2074 = vmatprep.subr.bf16.mxu1 %v2150_v3  ;;  %v2156_v10 = vld [vmem:[%s3018_s1 + $0xa8] sm:$0xff]   ;;  %v2157_v12 = vld [vmem:[%s3018_s1 + $0x20] sm:$0xff]   ;;  %v2158_v13 = vld [vmem:[%s3018_s1 + $0x58] sm:$0xff]  }
   0xf   : > { %2075 = vmatpush3.bf16.msra.mxu1 %v2150_v3  ;;  %v2159_v14 = vld [vmem:[%s3018_s1 + $0xa0] sm:$0xff]   ;;  %v252_v15 = vadd.s32 8, %v2288_v11  ;;  %v254_v16 = vadd.s32 24, %v2288_v11  ;;  %v2160_v17 = vld [vmem:[%s3018_s1 + $0x18] sm:$0xff]   ;;  %v271_v19 = vand.u32 15, %v2288_v11  ;;  %v2161_v20 = vld [vmem:[%s3018_s1 + $0x50] sm:$0xff]  }
  0x10   : > { %2076 = vmatprep.subr.bf16.mxu1 %v2153_v7  ;;  %v2162_v18 = vld [vmem:[%s3018_s1 + $0x98] sm:$0xff]   ;;  %v2163_v23 = vld [vmem:[%s3018_s1 + $0x10] sm:$0xff]   ;;  %vm3023_vm0 = vcmp.lt.s32.totalorder %v2288_v11, 1  ;;  %v253_v24 = vadd.s32 16, %v2288_v11  ;;  %v2323_v26 = vadd.s32 32, %v2288_v11  ;;  %v2164_v27 = vld [vmem:[%s3018_s1 + $0x48] sm:$0xff]  }
  0x11   : > { %1917 = vmatpush3.bf16.msra.mxu0 %v2151_v4  ;;  %v278_v21 = vand.u32 15, %v252_v15  ;;  %v292_v22 = vand.u32 15, %v254_v16  ;;  %v2165_v25 = vld [vmem:[%s3018_s1 + $0x90] sm:$0xff]   ;;  %vm2335_vm1 = vcmp.ne.s32.totalorder %v271_v19, 0  ;;  %vm3024_vm2 = vcmp.lt.s32.totalorder %v2288_v11, 7  ;;  %v2166_v29 = vld [vmem:[%s3018_s1 + $0x8] sm:$0xff]  }
  0x12   : > { %1918 = vmatprep.subr.bf16.mxu0 %v2152_v5  ;;  %v2167_v31 = vld [vmem:[%s3018_s1 + $0x40] sm:$0xff]   ;;  %v2168_v32 = vld [vmem:[%s3018_s1 + $0x88] sm:$0xff]   ;;  %v256_v33 = vadd.s32 40, %v2288_v11  ;;  %v249_v36 = vld [vmem:[%s2333_s14 + $0x78] sm:$0xff]  ;;  %v285_v38 = vand.u32 15, %v253_v24  ;;  %v299_v39 = vand.u32 15, %v2323_v26 }
  0x13   : > { %2077 = vmatpush3.bf16.msra.mxu1 %v2153_v7  ;;  %vm2343_vm3 = vcmp.ne.s32.totalorder %v278_v21, 15  ;;  %v234_v34 = vld [vmem:[%s2333_s14] sm:$0xff]  ;;  %v235_v35 = vld [vmem:[%s2333_s14 + $0x8] sm:$0xff]  ;;  %vm2357_vm4 = vcmp.ne.s32.totalorder %v292_v22, 15  ;;  %vm506_vm7 = vcmp.gt.f32.partialorder %v249_v36, 0.0  ;;  %v236_v46 = vld [vmem:[%s2333_s14 + $0x10] sm:$0xff] }
  0x14   : > { %2078 = vmatprep.subr.bf16.mxu1 %v2156_v10  ;;  %vm491_vm5 = vcmp.gt.f32.partialorder %v234_v34, 0.0  ;;  %vm492_vm6 = vcmp.gt.f32.partialorder %v235_v35, 0.0  ;;  %v507_v40 = vmul.f32 0.01, %v234_v34  ;;  %v508_v41 = vmul.f32 0.01, %v235_v35  ;;  %vm2401_vm13 = vmpackc.low %vm2219_vm12, %vm2335_vm1 }
  0x15   : > { %1919 = vmatpush3.bf16.msra.mxu0 %v2154_v8  ;;  %v2169_v42 = vld [vmem:[%s3018_s1] sm:$0xff]   ;;  %v522_v43 = vmul.f32 0.01, %v249_v36  ;;  %v237_v47 = vld [vmem:[%s2333_s14 + $0x18] sm:$0xff]  ;;  %v306_v48 = vand.u32 15, %v256_v33  ;;  %v2370_v49 = vadd.s32 56, %v2288_v11  ;;  %vm2423_vm1 = vmpackc.low %vm2357_vm4, %vm2219_vm12 }
  0x16   : > { %1920 = vmatprep.subr.bf16.mxu0 %v2155_v9  ;;  %v2365_v44 = vsel %vm491_vm5, %v234_v34, %v507_v40  ;;  %v524_v45 = vsel %vm492_vm6, %v235_v35, %v508_v41  ;;  %v2170_v54 = vld [vmem:[%s3018_s1 + $0x80] sm:$0xff]   ;;  %vm493_vm8 = vcmp.gt.f32.partialorder %v236_v46, 0.0  ;;  %v509_v58 = vmul.f32 0.01, %v236_v46  ;;  %v239_v60 = vld [vmem:[%s2333_s14 + $0x28] sm:$0xff]  ;;  %vm2412_vm5 = vmpackc.low %vm2343_vm3, %vm2219_vm12 }
  0x17   : > { %2079 = vmatpush3.bf16.msra.mxu1 %v2156_v10  ;;  %v539_v50 = vrot.slane %v2365_v44, 7  ;;  %v540_v51 = vrot.slane %v524_v45, 7  ;;  %v588_v52 = vrot.slane %v2365_v44, 1  ;;  %v589_v53 = vrot.slane %v524_v45, 1  ;;  %v238_v55 = vld [vmem:[%s2333_s14 + $0x20] sm:$0xff]  ;;  %v243_v35 = vld [vmem:[%s2333_s14 + $0x48] sm:$0xff] }
  0x18   : > { %2080 = vmatprep.subr.bf16.mxu1 %v2159_v14  ;;  %v645_v56 = vpack.c.bf16 %v524_v45, %v2365_v44  ;;  %v2380_v57 = vsel %vm506_vm7, %v249_v36, %v522_v43  ;;  %vm2382_vm9 = vcmp.ne.s32.totalorder %v285_v38, 0  ;;  %vm494_vm10 = vcmp.gt.f32.partialorder %v237_v47, 0.0  ;;  %v242_v28 = vld [vmem:[%s2333_s14 + $0x40] sm:$0xff]  ;;  %v245_v7 = vld [vmem:[%s2333_s14 + $0x58] sm:$0xff] }
  0x19   : > { %1921 = vmatpush3.bf16.msra.mxu0 %v2157_v12  ;;  %v554_v61 = vrot.slane %v2380_v57, 7  ;;  %v570_v62 = vsel %vm3023_vm0, %v539_v50, %v540_v51  ;;  %v619_v63 = vsel %vm3024_vm2, %v588_v52, %v589_v53  ;;  %v525_v0 = vsel %vm493_vm8, %v236_v46, %v509_v58  ;;  %vm2459_vm8 = vmpackc.low %vm2219_vm12, %vm2382_vm9 }
  0x1a   : > { %1922 = vmatprep.subr.bf16.mxu0 %v2158_v13  ;;  %892 = vmatprep.mubr.bf16.mxu0 %v645_v56  ;;  %vm495_vm11 = vcmp.gt.f32.partialorder %v238_v55, 0.0  ;;  %v510_v1 = vmul.f32 0.01, %v237_v47  ;;  %v511_v2 = vmul.f32 0.01, %v238_v55  ;;  %v541_v5 = vrot.slane %v525_v0, 7 }
  0x1b   : > { %2081 = vmatpush3.bf16.msra.mxu1 %v2159_v14  ;;  %v571_v3 = vsel %vm3023_vm0, %v554_v61, %v539_v50  ;;  %v590_v6 = vrot.slane %v525_v0, 1  ;;  %vm496_vm14 = vcmp.gt.f32.partialorder %v239_v60, 0.0  ;;  %vm2405_vm15 = vcmp.ne.s32.totalorder %v306_v48, 15  ;;  %v240_v14 = vld [vmem:[%s2333_s14 + $0x30] sm:$0xff] }
  0x1c   : > { %2082 = vmatprep.subr.bf16.mxu1 %v2162_v18  ;;  %v1743_v8 = vpack.c.bf16 %v570_v62, %v571_v3  ;;  %v526_v10 = vsel %vm494_vm10, %v237_v47, %v510_v1  ;;  %v527_v12 = vsel %vm495_vm11, %v238_v55, %v511_v2  ;;  %v512_v13 = vmul.f32 0.01, %v239_v60  ;;  %vm2482_vm11 = vmpackc.low %vm2405_vm15, %vm2219_vm12  ;;  %v244_v62 = vld [vmem:[%s2333_s14 + $0x50] sm:$0xff] }
  0x1d   : > { %1923 = vmatpush3.bf16.msra.mxu0 %v2160_v17  ;;  %v618_v15 = vsel %vm3024_vm2, %v589_v53, %v590_v6  ;;  %v591_v16 = vrot.slane %v526_v10, 1  ;;  %v592_v17 = vrot.slane %v527_v12, 1  ;;  %v646_v19 = vpack.c.bf16 %v526_v10, %v525_v0 }
  0x1e   : > { %1924 = vmatprep.subr.bf16.mxu0 %v2161_v20  ;;  %v1775_v20 = vpack.c.bf16 %v618_v15, %v619_v63  ;;  %v542_v21 = vrot.slane %v526_v10, 7  ;;  %v2430_v22 = vsel %vm496_vm14, %v239_v60, %v512_v13  ;;  %vm2449_vm3 = vcmp.ne.s32.totalorder %v299_v39, 0 }
  0x1f   : > { %2083 = vmatpush3.bf16.msra.mxu1 %v2162_v18  ;;  %v616_v24 = vsel %vm3024_vm2, %v591_v16, %v592_v17  ;;  %v593_v33 = vrot.slane %v2430_v22, 1  ;;  %v543_v36 = vrot.slane %v527_v12, 7  ;;  %vm497_vm4 = vcmp.gt.f32.partialorder %v240_v14, 0.0  ;;  %vm2516_vm15 = vmpackc.low %vm2219_vm12, %vm2449_vm3 }
  0x20   : > { %2084 = vmatprep.subr.bf16.mxu1 %v2165_v25  ;;  %2090 = vmatprep.mubr.msk.bf16.mxu1 %vm2412_vm5, %v1775_v20  ;;  %v513_v37 = vmul.f32 0.01, %v240_v14  ;;  %vm499_vm7 = vcmp.gt.f32.partialorder %v242_v28, 0.0  ;;  %v647_v26 = vpack.c.bf16 %v2430_v22, %v527_v12  ;;  %v257_v47 = vadd.s32 48, %v2288_v11  ;;  %v246_v12 = vld [vmem:[%s2333_s14 + $0x60] sm:$0xff] }
  0x21   : > { %1925 = vmatpush3.bf16.msra.mxu0 %v2163_v23  ;;  %v241_v23 = vld [vmem:[%s2333_s14 + $0x38] sm:$0xff]  ;;  %v615_v45 = vsel %vm3024_vm2, %v592_v17, %v593_v33  ;;  %vm500_vm9 = vcmp.gt.f32.partialorder %v243_v35, 0.0  ;;  %v516_v50 = vmul.f32 0.01, %v243_v35  ;;  %v567_v58 = vsel %vm3023_vm0, %v542_v21, %v543_v36 }
  0x22   : > { %1926 = vmatprep.subr.bf16.mxu0 %v2164_v27  ;;  %v569_v27 = vsel %vm3023_vm0, %v540_v51, %v541_v5  ;;  %vm498_vm6 = vcmp.gt.f32.partialorder %v241_v23, 0.0  ;;  %v529_v39 = vsel %vm497_vm4, %v240_v14, %v513_v37  ;;  %v514_v41 = vmul.f32 0.01, %v241_v23 }
  0x23   : > { %2085 = vmatpush3.bf16.msra.mxu1 %v2165_v25  ;;  %v617_v25 = vsel %vm3024_vm2, %v590_v6, %v591_v16  ;;  %v594_v43 = vrot.slane %v529_v39, 1  ;;  %v545_v60 = vrot.slane %v529_v39, 7  ;;  %v2506_v3 = vsel %vm500_vm9, %v243_v35, %v516_v50 }
  0x24   : > { %2086 = vmatprep.subr.bf16.mxu1 %v2168_v32  ;;  %v1779_v30 = vpack.c.bf16 %v616_v24, %v617_v25  ;;  %v2471_v48 = vsel %vm498_vm6, %v241_v23, %v514_v41  ;;  %v597_v6 = vrot.slane %v2506_v3, 1  ;;  %v313_v10 = vand.u32 15, %v257_v47 }
  0x25   : > { %1927 = vmatpush3.bf16.msra.mxu0 %v2166_v29  ;;  %v320_v29 = vand.u32 15, %v2370_v49  ;;  %v614_v51 = vsel %vm3024_vm2, %v593_v33, %v594_v43  ;;  %v546_v2 = vrot.slane %v2471_v48, 7  ;;  %v3055_v13 = vmov 0 }
  0x26   : > { %1928 = vmatprep.subr.bf16.mxu0 %v2167_v31  ;;  %v568_v31 = vsel %vm3023_vm0, %v541_v5, %v542_v21  ;;  %v1783_v59 = vpack.c.bf16 %v614_v51, %v615_v45  ;;  %v3056_v13 = vsel %vm2516_vm15, 4294967295, %v3055_v13  ;;  %v648_v14 = vpack.c.bf16 %v2471_v48, %v529_v39 }
  0x27   : > { %2087 = vmatpush3.bf16.msra.mxu1 %v2168_v32  ;;  %v544_v32 = vrot.slane %v2430_v22, 7  ;;  %v1747_v38 = vpack.c.bf16 %v568_v31, %v569_v27  ;;  %vm2466_vm10 = vcmp.ne.s32.totalorder %v320_v29, 15  ;;  %v260_v15 = vadd.s32 72, %v2288_v11  ;;  %v247_v31 = vld [vmem:[%s2333_s14 + $0x68] sm:$0xff] }
  0x28   : > { %2088 = vmatprep.subr.bf16.mxu1 %v2170_v54  ;;  %vm2500_vm14 = vmpackc.low %vm2466_vm10, %vm2219_vm12  ;;  %vm501_vm4 = vcmp.gt.f32.partialorder %v244_v62, 0.0  ;;  %v517_v16 = vmul.f32 0.01, %v244_v62  ;;  %v564_v17 = vsel %vm3023_vm0, %v545_v60, %v546_v2  ;;  %v259_v20 = vadd.s32 64, %v2288_v11 }
  0x29   : > { %1929 = vmatpush3.bf16.msra.mxu0 %v2169_v42  ;;  %v515_v42 = vmul.f32 0.01, %v242_v28  ;;  %v566_v56 = vsel %vm3023_vm0, %v543_v36, %v544_v32  ;;  %v262_v21 = vadd.s32 88, %v2288_v11  ;;  %v334_v22 = vand.u32 15, %v260_v15 }
  0x2a   : > { %v2530_v23 = vsel %vm501_vm4, %v244_v62, %v517_v16  ;;  %vm502_vm3 = vcmp.gt.f32.partialorder %v245_v7, 0.0  ;;  %vm503_vm6 = vcmp.gt.f32.partialorder %v246_v12, 0.0  ;;  %v548_v33 = vrot.slane %v2506_v3, 7 }
  0x2b   : > { %2089 = vmatpush3.bf16.msra.mxu1 %v2170_v54  ;;  %v2473_v49 = vsel %vm499_vm7, %v242_v28, %v515_v42  ;;  %v595_v54 = vrot.slane %v2471_v48, 1  ;;  %v598_v25 = vrot.slane %v2530_v23, 1  ;;  %v348_v27 = vand.u32 15, %v262_v21  ;;  %v248_v48 = vld [vmem:[%s2333_s14 + $0x70] sm:$0xff] }
  0x2c   : > { %1744 = vmatmul.mubr.msk.bf16.vlgmr.msra.gmra.mxu0 %vm2401_vm13, %v1743_v8  ;;  %v596_v55 = vrot.slane %v2473_v49, 1  ;;  %v1751_v8 = vpack.c.bf16 %v566_v56, %v567_v58  ;;  %v518_v28 = vmul.f32 0.01, %v245_v7  ;;  %vm2537_vm7 = vcmp.ne.s32.totalorder %v313_v10, 0 }
  0x2d   : > { %900 = vmatprep.mubr.bf16.mxu0 %v646_v19  ;;  %v613_v0 = vsel %vm3024_vm2, %v594_v43, %v595_v54  ;;  %v565_v19 = vsel %vm3023_vm0, %v544_v32, %v545_v60  ;;  %vm1910_vm10 = vcmp.ne.s32.totalorder %v334_v22, 15  ;;  %v610_v34 = vsel %vm3024_vm2, %v597_v6, %v598_v25 }
  0x2e   : > { %2091 = vmatmul.mubr.msk.bf16.vlgmr.msra.gmra.mxu1 %vm2423_vm1, %v1779_v30  ;;  %v612_v63 = vsel %vm3024_vm2, %v595_v54, %v596_v55  ;;  %v611_v24 = vsel %vm3024_vm2, %v596_v55, %v597_v6  ;;  %v519_v30 = vmul.f32 0.01, %v246_v12  ;;  %v1755_v32 = vpack.c.bf16 %v564_v17, %v565_v19  ;;  %vm2546_vm9 = vmpackc.low %vm1910_vm10, %vm2219_vm12 }
  0x2f   : > { %2094 = vmatprep.mubr.msk.bf16.mxu1 %vm2482_vm11, %v1783_v59  ;;  %v1787_v5 = vpack.c.bf16 %v612_v63, %v613_v0  ;;  %v2551_v36 = vsel %vm502_vm3, %v245_v7, %v518_v28  ;;  %v1791_v37 = vpack.c.bf16 %v610_v34, %v611_v24  ;;  %vm1911_vm4 = vcmp.ne.s32.totalorder %v348_v27, 15  ;;  %vm2561_vm10 = vmpackc.low %vm2219_vm12, %vm2537_vm7  ;;  %v2179_v59 = vld [vmem:[%s3020_s3 + $0x78] sm:$0xff]  }
  0x30   : > { %v327_v39 = vand.u32 15, %v259_v20  ;;  %v547_v41 = vrot.slane %v2473_v49, 7  ;;  %vm504_vm0 = vcmp.gt.f32.partialorder %v247_v31, 0.0  ;;  %v3061_v43 = vmov 0  ;;  %vm2575_vm3 = vmpackc.low %vm1911_vm4, %vm2219_vm12  ;;  %1994 = vmatprep.subr.bf16.mxu1 %v2179_v59 }
  0x31   : > { %v3062_v43 = vsel %vm2561_vm10, 4294967295, %v3061_v43  ;;  %v649_v45 = vpack.c.bf16 %v2506_v3, %v2473_v49  ;;  %v520_v47 = vmul.f32 0.01, %v247_v31  ;;  %v264_v54 = vadd.s32 104, %v2288_v11 }
  0x32   : > { %v261_v62 = vadd.s32 80, %v2288_v11  ;;  %v521_v0 = vmul.f32 0.01, %v248_v48  ;;  %v266_v3 = vadd.s32 120, %v2288_v11  ;;  %v650_v15 = vpack.c.bf16 %v2551_v36, %v2530_v23 }
  0x33   : > { %v2580_v49 = vsel %vm504_vm0, %v247_v31, %v520_v47  ;;  %v362_v63 = vand.u32 15, %v264_v54  ;;  %vm505_vm0 = vcmp.gt.f32.partialorder %v248_v48, 0.0  ;;  %v549_v16 = vrot.slane %v2530_v23, 7  ;;  %v2174_v54 = vld [vmem:[%s3020_s3 + $0xa0] sm:$0xff]  }
  0x34   : > { %1748 = vmatmul.mubr.msk.bf16.gmra.mxu0 %vm2459_vm8, %v1747_v38  ;;  %v2553_v38 = vsel %vm503_vm6, %v246_v12, %v519_v30  ;;  %vm3065_vm6 = vcmp.lt.s32.totalorder %v2288_v11, 1  ;;  %v601_v60 = vrot.slane %v2580_v49, 1  ;;  %v537_v6 = vsel %vm505_vm0, %v248_v48, %v521_v0  ;;  %v2183_v0 = vld [vmem:[%s3020_s3 + $0x68] sm:$0xff]  }
  0x35   : > { %908 = vmatprep.mubr.bf16.mxu0 %v647_v26  ;;  %v599_v26 = vrot.slane %v2551_v36, 1  ;;  %v600_v42 = vrot.slane %v2553_v38, 1  ;;  %v562_v56 = vsel %vm3065_vm6, %v547_v41, %v548_v33  ;;  %vm3066_vm7 = vmmov %vm3065_vm6  ;;  %vm1912_vm4 = vcmp.ne.s32.totalorder %v362_v63, 15  ;;  %v2182_v63 = vld [vmem:[%s3020_s3 + $0x30] sm:$0xff]  }
  0x36   : > { %2095 = vmatmul.mubr.msk.bf16.gmra.mxu1 %vm2500_vm14, %v1787_v5  ;;  %v563_v58 = vsel %vm3066_vm7, %v546_v2, %v547_v41  ;;  %v603_v5 = vrot.slane %v2380_v57, 1  ;;  %v602_v7 = vrot.slane %v537_v6, 1  ;;  %vm3069_vm6 = vcmp.lt.s32.totalorder %v2288_v11, 7 }
  0x37   : > { %2098 = vmatprep.mubr.msk.bf16.mxu1 %vm2546_vm9, %v1791_v37  ;;  %v609_v46 = vsel %vm3024_vm2, %v598_v25, %v599_v26  ;;  %v608_v50 = vsel %vm3024_vm2, %v599_v26, %v600_v42  ;;  %vm2588_vm2 = vcmp.ne.s32.totalorder %v327_v39, 0  ;;  %v1759_v2 = vpack.c.bf16 %v562_v56, %v563_v58  ;;  %vm3070_vm7 = vmmov %vm3069_vm6  ;;  %v2177_v56 = vld [vmem:[%s3020_s3 + $0x88] sm:$0xff]   ;;  %v2178_v58 = vld [vmem:[%s3020_s3 + $0x80] sm:$0xff]  }
  0x38   : > { %v1795_v55 = vpack.c.bf16 %v608_v50, %v609_v46  ;;  %v376_v10 = vand.u32 15, %v266_v3  ;;  %v620_v12 = vsel %vm3070_vm7, %v603_v5, %v588_v52  ;;  %v550_v17 = vrot.slane %v2551_v36, 7  ;;  %vm3073_vm0 = vmmov %vm3069_vm6  ;;  %v2173_v50 = vld [vmem:[%s3020_s3 + $0xa8] sm:$0xff]  }
  0x39   : > { %v341_v19 = vand.u32 15, %v261_v62  ;;  %v606_v44 = vsel %vm3073_vm0, %v601_v60, %v602_v7  ;;  %v263_v27 = vadd.s32 96, %v2288_v11  ;;  %v3081_v29 = vmov 0  ;;  %v2181_v62 = vld [vmem:[%s3020_s3 + $0x70] sm:$0xff]   ;;  %v2184_v3 = vld [vmem:[%s3020_s3 + $0x28] sm:$0xff]  }
  0x3a   : > { %vm1913_vm7 = vcmp.ne.s32.totalorder %v376_v10, 15  ;;  %v552_v30 = vrot.slane %v2580_v49, 7  ;;  %v651_v31 = vpack.c.bf16 %v2580_v49, %v2553_v38  ;;  %v265_v37 = vadd.s32 112, %v2288_v11  ;;  %v2176_v49 = vld [vmem:[%s3020_s3 + $0x90] sm:$0xff]  }
  0x3b   : > { %v553_v41 = vrot.slane %v537_v6, 7  ;;  %v2190_v10 = vld [vmem:[%s3020_s3 + $0x10] sm:$0xff]  }
  0x3c   : > { %1752 = vmatmul.mubr.msk.bf16.gmra.mxu0 %vm2516_vm15, %v1751_v8  ;;  %v607_v8 = vsel %vm3069_vm6, %v600_v42, %v601_v60  ;;  %vm2618_vm6 = vmpackc.low %vm1912_vm4, %vm2219_vm12  ;;  %vm3079_vm4 = vcmp.lt.s32.totalorder %v2288_v11, 1  ;;  %v369_v42 = vand.u32 15, %v265_v37  ;;  %v2180_v60 = vld [vmem:[%s3020_s3 + $0x38] sm:$0xff]  }
  0x3d   : > { %916 = vmatprep.mubr.bf16.mxu0 %v648_v14  ;;  %v3071_v14 = vmov 0  ;;  %v1799_v21 = vpack.c.bf16 %v606_v44, %v607_v8  ;;  %vm2625_vm15 = vmpackc.low %vm1913_vm7, %vm2219_vm12  ;;  %v560_v24 = vsel %vm3079_vm4, %v549_v16, %v550_v17  ;;  %1995 = vmatpush3.bf16.msra.mxu1 %v2180_v60  ;;  %v2189_v8 = vld [vmem:[%s3020_s3 + $0x50] sm:$0xff]  }
  0x3e   : > { %2099 = vmatmul.mubr.msk.bf16.gmra.mxu1 %vm2575_vm3, %v1795_v55  ;;  %v2175_v55 = vld [vmem:[%s3020_s3 + $0x98] sm:$0xff]   ;;  %1996 = vmatprep.subr.bf16.mxu1 %v2181_v62 }
  0x3f   : > { %2102 = vmatprep.mubr.msk.bf16.mxu1 %vm2618_vm6, %v1799_v21 }
  0x41   : > { %1997 = vmatpush3.bf16.msra.mxu1 %v2182_v63 }
  0x42   : > { %1998 = vmatprep.subr.bf16.mxu1 %v2183_v0 }
  0x44   : > { %1756 = vmatmul.mubr.msk.bf16.gmra.mxu0 %vm2561_vm10, %v1755_v32  ;;  %vm2607_vm10 = vmpackc.low %vm2219_vm12, %vm2588_vm2  ;;  %v551_v32 = vrot.slane %v2553_v38, 7  ;;  %v652_v38 = vpack.c.bf16 %v2380_v57, %v537_v6  ;;  %v2171_v57 = vld [vmem:[%s3020_s3 + $0xb8] sm:$0xff]  }
  0x45   : > { %924 = vmatprep.mubr.bf16.mxu0 %v649_v45  ;;  %v3072_v14 = vsel %vm2607_vm10, 4294967295, %v3071_v14  ;;  %vm3076_vm2 = vmmov %vm3073_vm0  ;;  %2106 = vmatprep.subr.bf16.mxu0 %v2171_v57  ;;  %v2187_v6 = vld [vmem:[%s3020_s3 + $0x58] sm:$0xff]  }
  0x46   : > { %v605_v20 = vsel %vm3076_vm2, %v602_v7, %v603_v5  ;;  %vm3080_vm0 = vmmov %vm3079_vm4  ;;  %vm1903_vm2 = vcmp.ne.s32.totalorder %v341_v19, 0  ;;  %2107 = vmatpush3.bf16.msra.mxu0 %v2171_v57  ;;  %1999 = vmatpush3.bf16.msra.mxu1 %v2184_v3  ;;  %v2185_v5 = vld [vmem:[%s3020_s3 + $0x60] sm:$0xff]   ;;  %v2188_v7 = vld [vmem:[%s3020_s3 + $0x18] sm:$0xff]  }
  0x47   : > { %v1803_v23 = vpack.c.bf16 %v620_v12, %v605_v20  ;;  %v561_v25 = vsel %vm3080_vm0, %v548_v33, %v549_v16  ;;  %vm2641_vm7 = vmpackc.low %vm2219_vm12, %vm1903_vm2  ;;  %v355_v33 = vand.u32 15, %v263_v27  ;;  %v559_v36 = vsel %vm3080_vm0, %v550_v17, %v551_v32  ;;  %2000 = vmatprep.subr.bf16.mxu1 %v2185_v5  ;;  %v2191_v12 = vld [vmem:[%s3020_s3 + $0x48] sm:$0xff]   ;;  %v2193_v16 = vld [vmem:[%s3020_s3 + $0x40] sm:$0xff]  }
  0x48   : > { %v1763_v28 = vpack.c.bf16 %v560_v24, %v561_v25  ;;  %v3082_v29 = vsel %vm2641_vm7, 4294967295, %v3081_v29  ;;  %vm3083_vm4 = vmmov %vm3080_vm0  ;;  %v557_v46 = vsel %vm3080_vm0, %v552_v30, %v553_v41  ;;  %v2194_v17 = vld [vmem:[%s3020_s3] sm:$0xff]  }
  0x49   : > { %2103 = vmatmul.mubr.msk.bf16.gmra.mxu1 %vm2625_vm15, %v1803_v23  ;;  %v558_v34 = vsel %vm3083_vm4, %v551_v32, %v552_v30  ;;  %vm1904_vm2 = vcmp.ne.s32.totalorder %v355_v33, 0  ;;  %vm3086_vm4 = vmmov %vm3080_vm0  ;;  %v2752_v20 = vld [vmem:[%s3019_s2] ss:$0 sm:$0xff] }
  0x4a   : > { %v1767_v26 = vpack.c.bf16 %v558_v34, %v559_v36  ;;  %v556_v45 = vsel %vm3086_vm4, %v553_v41, %v554_v61  ;;  %v2172_v61 = vld [vmem:[%s3020_s3 + $0xb0] sm:$0xff]  }
  0x4b   : > { %v1771_v47 = vpack.c.bf16 %v556_v45, %v557_v46  ;;  %2108 = vmatprep.subr.bf16.mxu0 %v2172_v61 }
  0x4c   : > { %1760 = vmatmul.mubr.msk.bf16.gmra.mxu0 %vm2607_vm10, %v1759_v2  ;;  %vm2657_vm10 = vmpackc.low %vm2219_vm12, %vm1904_vm2  ;;  %vm1905_vm2 = vcmp.ne.s32.totalorder %v369_v42, 0  ;;  %v2186_v2 = vld [vmem:[%s3020_s3 + $0x20] sm:$0xff]  }
  0x4d   : > { %932 = vmatprep.mubr.bf16.mxu0 %v650_v15  ;;  %2109 = vmatpush3.bf16.msra.mxu0 %v2172_v61  ;;  %v2192_v15 = vld [vmem:[%s3020_s3 + $0x8] sm:$0xff]  }
  0x4e   : > { %2110 = vmatprep.subr.bf16.mxu0 %v2173_v50  ;;  %2001 = vmatpush3.bf16.msra.mxu1 %v2186_v2 }
  0x4f   : > { %2002 = vmatprep.subr.bf16.mxu1 %v2187_v6 }
  0x51   : > { %2111 = vmatpush3.bf16.msra.mxu0 %v2173_v50 }
  0x52   : > { %2112 = vmatprep.subr.bf16.mxu0 %v2174_v54  ;;  %2003 = vmatpush3.bf16.msra.mxu1 %v2188_v7 }
  0x53   : > { %2004 = vmatprep.subr.bf16.mxu1 %v2189_v8 }
  0x54   : > { %1764 = vmatmul.mubr.msk.bf16.gmra.mxu0 %vm2641_vm7, %v1763_v28  ;;  %vm2671_vm7 = vmpackc.low %vm2219_vm12, %vm1905_vm2 }
  0x55   : > { %940 = vmatprep.mubr.bf16.mxu0 %v651_v31  ;;  %2113 = vmatpush3.bf16.msra.mxu0 %v2174_v54 }
  0x56   : > { %2114 = vmatprep.subr.bf16.mxu0 %v2175_v55  ;;  %2005 = vmatpush3.bf16.msra.mxu1 %v2190_v10 }
  0x57   : > { %2006 = vmatprep.subr.bf16.mxu1 %v2191_v12 }
  0x59   : > { %2115 = vmatpush3.bf16.msra.mxu0 %v2175_v55 }
  0x5a   : > { %2116 = vmatprep.subr.bf16.mxu0 %v2176_v49  ;;  %2007 = vmatpush3.bf16.msra.mxu1 %v2192_v15 }
  0x5b   : > { %2008 = vmatprep.subr.bf16.mxu1 %v2193_v16 }
  0x5c   : > { %1768 = vmatmul.mubr.msk.bf16.gmra.mxu0 %vm2657_vm10, %v1767_v26 }
  0x5d   : > { %948 = vmatprep.mubr.bf16.mxu0 %v652_v38  ;;  %2117 = vmatpush3.bf16.msra.mxu0 %v2176_v49 }
  0x5e   : > { %2118 = vmatprep.subr.bf16.mxu0 %v2177_v56  ;;  %2009 = vmatpush3.bf16.msra.mxu1 %v2194_v17 }
  0x61   : > { %2119 = vmatpush3.bf16.msra.mxu0 %v2177_v56 }
  0x62   : > { %2120 = vmatprep.subr.bf16.mxu0 %v2178_v58 }
  0x64   : > { %1772 = vmatmul.mubr.msk.bf16.gmra.mxu0 %vm2671_vm7, %v1771_v47 }
  0x65   : > { %2121 = vmatpush3.bf16.msra.mxu0 %v2178_v58 }
  0xec   : > { %v1930_v19 = vpop.f32.mrf.mxu0 }
  0xee   : > { %v1931_v44 = vpop.f32.mrf.mxu0  ;;  %v2092_v24 = vpop.f32.mrf.mxu1 }
  0xef   : > { %v1932_v21 = vadd.f32 %v1931_v44, %v1930_v19 }
  0xf0   : > { %v1933_v23 = vpop.f32.mrf.mxu0  ;;  %v991_v28 = vpop.f32.mrf.mxu1 }
  0xf1   : > { %v895_v25 = vadd.f32 %v1932_v21, %v2752_v20 }
  0xf2   : > { %v1934_v27 = vpop.f32.mrf.mxu0  ;;  %v2093_v33 = vpop.f32.mrf.mxu1 }
  0xf3   : > { %v1935_v30 = vadd.f32 %v1934_v27, %v1933_v23  ;;  %v992_v31 = vadd.f32 %v991_v28, %v895_v25 }
  0xf4   : > { %v1936_v32 = vpop.f32.mrf.mxu0  ;;  %v994_v37 = vpop.f32.mrf.mxu1 }
  0xf5   : > { %v898_v34 = vadd.f32 %v1935_v30, %v2752_v20  ;;  %v1070_v26 = vmul.f32 0.01, %v992_v31  ;;  %vm1054_vm12 = vcmp.gt.f32.partialorder %v992_v31, 0.0 }
  0xf6   : > { %v1937_v36 = vpop.f32.mrf.mxu0  ;;  %v2096_v47 = vpop.f32.mrf.mxu1 }
  0xf7   : > { %v1938_v38 = vadd.f32 %v1937_v36, %v1936_v32  ;;  %v995_v41 = vadd.f32 %v994_v37, %v898_v34  ;;  %v2757_v61 = vsel %vm1054_vm12, %v992_v31, %v1070_v26  ;;  %vm3089_vm12 = vcmp.lt.s32.totalorder %v2288_v11, 7 }
  0xf8   : > { %v1939_v42 = vpop.f32.mrf.mxu0  ;;  %v1007_v58 = vpop.f32.mrf.mxu1  ;;  %v1150_v2 = vrot.slane %v2757_v61, 1 }
  0xf9   : > { %v903_v45 = vadd.f32 %v1938_v38, %v2752_v20  ;;  %vm1055_vm4 = vcmp.gt.f32.partialorder %v995_v41, 0.0  ;;  %v1071_v46 = vmul.f32 0.01, %v995_v41 }
  0xfa   : > { %v1940_v57 = vpop.f32.mrf.mxu0  ;;  %v2097_v8 = vpop.f32.mrf.mxu1 }
  0xfb   : > { %v1000_v50 = vadd.f32 %v2092_v24, %v903_v45  ;;  %v2759_v54 = vsel %vm1055_vm4, %v995_v41, %v1071_v46  ;;  %v1941_v55 = vadd.f32 %v1940_v57, %v1939_v42  ;;  %vm3090_vm4 = vmmov %vm3089_vm12 }
  0xfc   : > { %v1942_v49 = vpop.f32.mrf.mxu0  ;;  %v1206_v56 = vpack.c.bf16 %v2759_v54, %v2757_v61  ;;  %v1151_v62 = vrot.slane %v2759_v54, 1  ;;  %v1010_v25 = vpop.f32.mrf.mxu1 }
  0xfd   : > { %vm1056_vm0 = vcmp.gt.f32.partialorder %v1000_v50, 0.0  ;;  %v1072_v59 = vmul.f32 0.01, %v1000_v50  ;;  %v906_v60 = vadd.f32 %v1941_v55, %v2752_v20 }
  0xfe   : > { %v1943_v63 = vpop.f32.mrf.mxu0  ;;  %1453 = vmatprep.mubr.bf16.mxu1 %v1206_v56  ;;  %v1180_v17 = vsel %vm3090_vm4, %v1150_v2, %v1151_v62  ;;  %v2100_v26 = vpop.f32.mrf.mxu1 }
  0xff   : > { %v2765_v0 = vsel %vm1056_vm0, %v1000_v50, %v1072_v59  ;;  %v1003_v3 = vadd.f32 %v2093_v33, %v906_v60  ;;  %v1944_v5 = vadd.f32 %v1943_v63, %v1942_v49 }
 0x100   : > { %v1152_v6 = vrot.slane %v2765_v0, 1  ;;  %v1945_v7 = vpop.f32.mrf.mxu0  ;;  %v1023_v56 = vpop.f32.mrf.mxu1 }
 0x101   : > { %vm1057_vm2 = vcmp.gt.f32.partialorder %v1003_v3, 0.0  ;;  %v1073_v10 = vmul.f32 0.01, %v1003_v3  ;;  %v911_v12 = vadd.f32 %v1944_v5, %v2752_v20 }
 0x102   : > { %v1946_v15 = vpop.f32.mrf.mxu0  ;;  %v1179_v16 = vsel %vm3089_vm12, %v1151_v62, %v1152_v6  ;;  %vm3091_vm12 = vmmov %vm3090_vm4 }
 0x103   : > { %v2776_v19 = vsel %vm1057_vm2, %v1003_v3, %v1073_v10  ;;  %v1947_v44 = vadd.f32 %v1946_v15, %v1945_v7  ;;  %v1008_v21 = vadd.f32 %v1007_v58, %v911_v12  ;;  %v1864_v23 = vpack.c.bf16 %v1179_v16, %v1180_v17  ;;  %v2101_v7 = vpop.f32.mrf.mxu1 }
 0x104   : > { %v1948_v24 = vpop.f32.mrf.mxu0  ;;  %v1153_v30 = vrot.slane %v2776_v19, 1  ;;  %v1105_v52 = vrot.slane %v2776_v19, 7 }
 0x105   : > { %vm1058_vm0 = vcmp.gt.f32.partialorder %v1008_v21, 0.0  ;;  %v1074_v27 = vmul.f32 0.01, %v1008_v21  ;;  %2122 = vmatprep.mubr.msk.bf16.mxu0 %vm2412_vm5, %v1864_v23  ;;  %v914_v28 = vadd.f32 %v1947_v44, %v2752_v20  ;;  %vm3092_vm5 = vmmov %vm3090_vm4 }
 0x106   : > { %v1949_v31 = vpop.f32.mrf.mxu0  ;;  %v1178_v42 = vsel %vm3092_vm5, %v1152_v6, %v1153_v30 }
 0x107   : > { %v2782_v32 = vsel %vm1058_vm0, %v1008_v21, %v1074_v27  ;;  %v1950_v33 = vadd.f32 %v1949_v31, %v1948_v24  ;;  %v1011_v34 = vadd.f32 %v1010_v25, %v914_v28  ;;  %v1026_v24 = vpop.f32.mrf.mxu1 }
 0x108   : > { %v1154_v36 = vrot.slane %v2782_v32, 1  ;;  %v1951_v37 = vpop.f32.mrf.mxu0  ;;  %v1106_v4 = vrot.slane %v2782_v32, 7 }
 0x109   : > { %v919_v38 = vadd.f32 %v1950_v33, %v2752_v20  ;;  %vm1059_vm2 = vcmp.gt.f32.partialorder %v1011_v34, 0.0  ;;  %v1075_v41 = vmul.f32 0.01, %v1011_v34 }
 0x10a   : > { %v1177_v9 = vsel %vm3091_vm12, %v1153_v30, %v1154_v36  ;;  %v1952_v45 = vpop.f32.mrf.mxu0 }
 0x10b   : > { %v1868_v46 = vpack.c.bf16 %v1177_v9, %v1178_v42  ;;  %v1016_v57 = vadd.f32 %v2096_v47, %v919_v38  ;;  %v2790_v50 = vsel %vm1059_vm2, %v1011_v34, %v1075_v41  ;;  %v1953_v55 = vadd.f32 %v1952_v45, %v1951_v37  ;;  %vm3093_vm2 = vmmov %vm3092_vm5  ;;  %v2104_v38 = vpop.f32.mrf.mxu1 }
 0x10c   : > { %v1954_v49 = vpop.f32.mrf.mxu0  ;;  %v1155_v60 = vrot.slane %v2790_v50, 1 }
 0x10d   : > { %vm1060_vm4 = vcmp.gt.f32.partialorder %v1016_v57, 0.0  ;;  %v1076_v58 = vmul.f32 0.01, %v1016_v57  ;;  %v922_v59 = vadd.f32 %v1953_v55, %v2752_v20  ;;  %2123 = vmatmul.mubr.msk.bf16.vlgmr.msra.gmra.mxu0 %vm2423_vm1, %v1868_v46  ;;  %vm3094_vm1 = vmmov %vm3093_vm2 }
 0x10e   : > { %v1955_v62 = vpop.f32.mrf.mxu0  ;;  %v1176_v16 = vsel %vm3094_vm1, %v1154_v36, %v1155_v60 }
 0x10f   : > { %v2796_v63 = vsel %vm1060_vm4, %v1016_v57, %v1076_v58  ;;  %v1019_v3 = vadd.f32 %v2097_v8, %v922_v59  ;;  %v1956_v5 = vadd.f32 %v1955_v62, %v1954_v49  ;;  %vm3096_vm4 = vmmov %vm3094_vm1  ;;  %v1039_v58 = vpop.f32.mrf.mxu1 }
 0x110   : > { %v1156_v47 = vrot.slane %v2796_v63, 1  ;;  %v1957_v6 = vpop.f32.mrf.mxu0  ;;  %v1108_v40 = vrot.slane %v2796_v63, 7 }
 0x111   : > { %vm1061_vm0 = vcmp.gt.f32.partialorder %v1019_v3, 0.0  ;;  %v1077_v10 = vmul.f32 0.01, %v1019_v3  ;;  %v927_v12 = vadd.f32 %v1956_v5, %v2752_v20 }
 0x112   : > { %v1958_v15 = vpop.f32.mrf.mxu0  ;;  %v1175_v18 = vsel %vm3093_vm2, %v1155_v60, %v1156_v47 }
 0x113   : > { %v2804_v17 = vsel %vm1061_vm0, %v1019_v3, %v1077_v10  ;;  %v1959_v44 = vadd.f32 %v1958_v15, %v1957_v6  ;;  %v1024_v8 = vadd.f32 %v1023_v56, %v927_v12  ;;  %v1872_v21 = vpack.c.bf16 %v1175_v18, %v1176_v16  ;;  %v2105_v12 = vpop.f32.mrf.mxu1 }
 0x114   : > { %v1960_v23 = vpop.f32.mrf.mxu0  ;;  %v1157_v28 = vrot.slane %v2804_v17, 1 }
 0x115   : > { %vm1062_vm12 = vcmp.gt.f32.partialorder %v1024_v8, 0.0  ;;  %v1078_v25 = vmul.f32 0.01, %v1024_v8  ;;  %2126 = vmatprep.mubr.msk.bf16.mxu0 %vm2482_vm11, %v1872_v21  ;;  %v930_v27 = vadd.f32 %v1959_v44, %v2752_v20  ;;  %vm3095_vm11 = vmmov %vm3094_vm1 }
 0x116   : > { %v1961_v30 = vpop.f32.mrf.mxu0  ;;  %v1174_v45 = vsel %vm3096_vm4, %v1156_v47, %v1157_v28 }
 0x117   : > { %v2810_v31 = vsel %vm1062_vm12, %v1024_v8, %v1078_v25  ;;  %v1962_v33 = vadd.f32 %v1961_v30, %v1960_v23  ;;  %v1027_v34 = vadd.f32 %v1026_v24, %v930_v27  ;;  %v1042_v25 = vpop.f32.mrf.mxu1 }
 0x118   : > { %v1158_v36 = vrot.slane %v2810_v31, 1  ;;  %v1963_v37 = vpop.f32.mrf.mxu0 }
 0x119   : > { %v935_v41 = vadd.f32 %v1962_v33, %v2752_v20  ;;  %vm1063_vm5 = vcmp.gt.f32.partialorder %v1027_v34, 0.0  ;;  %v1079_v9 = vmul.f32 0.01, %v1027_v34 }
 0x11a   : > { %v1964_v42 = vpop.f32.mrf.mxu0  ;;  %v1173_v53 = vsel %vm3095_vm11, %v1157_v28, %v1158_v36  ;;  %vm3098_vm11 = vmmov %vm3094_vm1 }
 0x11b   : > { %v1032_v46 = vadd.f32 %v2100_v26, %v935_v41  ;;  %v2818_v57 = vsel %vm1063_vm5, %v1027_v34, %v1079_v9  ;;  %v1965_v55 = vadd.f32 %v1964_v42, %v1963_v37  ;;  %v1876_v49 = vpack.c.bf16 %v1173_v53, %v1174_v45 }
 0x11c   : > { %v1966_v56 = vpop.f32.mrf.mxu0  ;;  %v1159_v62 = vrot.slane %v2818_v57, 1 }
 0x11d   : > { %vm1064_vm0 = vcmp.gt.f32.partialorder %v1032_v46, 0.0  ;;  %v1080_v59 = vmul.f32 0.01, %v1032_v46  ;;  %v938_v60 = vadd.f32 %v1965_v55, %v2752_v20  ;;  %2127 = vmatmul.mubr.msk.bf16.gmra.mxu0 %vm2500_vm14, %v1876_v49  ;;  %vm3097_vm14 = vmmov %vm3094_vm1 }
 0x11e   : > { %v1967_v3 = vpop.f32.mrf.mxu0  ;;  %v1172_v44 = vsel %vm3097_vm14, %v1158_v36, %v1159_v62 }
 0x11f   : > { %v2824_v5 = vsel %vm1064_vm0, %v1032_v46, %v1080_v59  ;;  %v1035_v47 = vadd.f32 %v2101_v7, %v938_v60  ;;  %v1968_v26 = vadd.f32 %v1967_v3, %v1966_v56 }
 0x120   : > { %v1160_v6 = vrot.slane %v2824_v5, 1  ;;  %v1969_v10 = vpop.f32.mrf.mxu0 }
 0x121   : > { %vm1065_vm2 = vcmp.gt.f32.partialorder %v1035_v47, 0.0  ;;  %v1081_v15 = vmul.f32 0.01, %v1035_v47  ;;  %v943_v18 = vadd.f32 %v1968_v26, %v2752_v20 }
 0x122   : > { %v1970_v16 = vpop.f32.mrf.mxu0  ;;  %v1171_v1 = vsel %vm3094_vm1, %v1159_v62, %v1160_v6 }
 0x123   : > { %v2832_v8 = vsel %vm1065_vm2, %v1035_v47, %v1081_v15  ;;  %v1971_v21 = vadd.f32 %v1970_v16, %v1969_v10  ;;  %v1040_v7 = vadd.f32 %v1039_v58, %v943_v18  ;;  %v1880_v23 = vpack.c.bf16 %v1171_v1, %v1172_v44  ;;  %vm3100_vm2 = vmmov %vm3094_vm1 }
 0x124   : > { %v1972_v24 = vpop.f32.mrf.mxu0  ;;  %v1161_v30 = vrot.slane %v2832_v8, 1  ;;  %v1102_v18 = vrot.slane %v2757_v61, 7 }
 0x125   : > { %vm1066_vm12 = vcmp.gt.f32.partialorder %v1040_v7, 0.0  ;;  %v1082_v27 = vmul.f32 0.01, %v1040_v7  ;;  %2130 = vmatprep.mubr.msk.bf16.mxu0 %vm2546_vm9, %v1880_v23  ;;  %v946_v28 = vadd.f32 %v1971_v21, %v2752_v20  ;;  %vm3099_vm9 = vmmov %vm3094_vm1 }
 0x126   : > { %v1973_v33 = vpop.f32.mrf.mxu0  ;;  %v1170_v46 = vsel %vm3099_vm9, %v1160_v6, %v1161_v30  ;;  %v1103_v6 = vrot.slane %v2759_v54, 7  ;;  %vm3109_vm9 = vnez %v3056_v13  ;;  %v1110_v13 = vrot.slane %v2810_v31, 7 }
 0x127   : > { %v2838_v34 = vsel %vm1066_vm12, %v1040_v7, %v1082_v27  ;;  %v1974_v36 = vadd.f32 %v1973_v33, %v1972_v24  ;;  %v1043_v37 = vadd.f32 %v1042_v25, %v946_v28  ;;  %vm3103_vm12 = vmmov %vm3094_vm1  ;;  %v1207_v24 = vpack.c.bf16 %v2776_v19, %v2765_v0 }
 0x128   : > { %v1162_v41 = vrot.slane %v2838_v34, 1  ;;  %v1975_v9 = vpop.f32.mrf.mxu0  ;;  %v1104_v25 = vrot.slane %v2765_v0, 7  ;;  %v1107_v28 = vrot.slane %v2790_v50, 7  ;;  %v1208_v19 = vpack.c.bf16 %v2790_v50, %v2782_v32 }
 0x129   : > { %v951_v42 = vadd.f32 %v1974_v36, %v2752_v20  ;;  %vm1067_vm5 = vcmp.gt.f32.partialorder %v1043_v37, 0.0  ;;  %v1083_v53 = vmul.f32 0.01, %v1043_v37  ;;  %v1109_v33 = vrot.slane %v2804_v17, 7 }
 0x12a   : > { %v1976_v45 = vpop.f32.mrf.mxu0  ;;  %v1169_v35 = vsel %vm3098_vm11, %v1161_v30, %v1162_v41  ;;  %v1209_v36 = vpack.c.bf16 %v2804_v17, %v2796_v63 }
 0x12b   : > { %v1048_v55 = vadd.f32 %v2104_v38, %v951_v42  ;;  %v2846_v49 = vsel %vm1067_vm5, %v1043_v37, %v1083_v53  ;;  %v1977_v56 = vadd.f32 %v1976_v45, %v1975_v9  ;;  %v1884_v58 = vpack.c.bf16 %v1169_v35, %v1170_v46  ;;  %vm3104_vm5 = vmmov %vm3094_vm1 }
 0x12c   : > { %v1163_v62 = vrot.slane %v2846_v49, 1  ;;  %v1210_v9 = vpack.c.bf16 %v2818_v57, %v2810_v31  ;;  %v1113_v53 = vrot.slane %v2832_v8, 7  ;;  %v1211_v45 = vpack.c.bf16 %v2832_v8, %v2824_v5 }
 0x12d   : > { %vm1068_vm4 = vcmp.gt.f32.partialorder %v1048_v55, 0.0  ;;  %v1084_v59 = vmul.f32 0.01, %v1048_v55  ;;  %v954_v60 = vadd.f32 %v1977_v56, %v2752_v20  ;;  %2131 = vmatmul.mubr.msk.bf16.gmra.mxu0 %vm2575_vm3, %v1884_v58  ;;  %vm3101_vm3 = vcmp.lt.s32.totalorder %v2288_v11, 1 }
 0x12e   : > { %v1168_v20 = vsel %vm3094_vm1, %v1162_v41, %v1163_v62  ;;  %v1132_v54 = vsel %vm3101_vm3, %v1102_v18, %v1103_v6  ;;  %vm3102_vm14 = vmmov %vm3101_vm3  ;;  %v1111_v41 = vrot.slane %v2818_v57, 7  ;;  %v1115_v46 = vrot.slane %v2846_v49, 7 }
 0x12f   : > { %v2852_v3 = vsel %vm1068_vm4, %v1048_v55, %v1084_v59  ;;  %v1051_v47 = vadd.f32 %v2105_v12, %v954_v60  ;;  %vm3106_vm11 = vmmov %vm3101_vm3  ;;  %v1212_v55 = vpack.c.bf16 %v2846_v49, %v2838_v34 }
 0x130   : > { %v1164_v26 = vrot.slane %v2852_v3, 1  ;;  %vm3111_vm4 = vmmov %vm3101_vm3  ;;  %v1116_v49 = vrot.slane %v2852_v3, 7 }
 0x131   : > { %vm1069_vm0 = vcmp.gt.f32.partialorder %v1051_v47, 0.0  ;;  %v1085_v38 = vmul.f32 0.01, %v1051_v47  ;;  %v1127_v50 = vsel %vm3111_vm4, %v1107_v28, %v1108_v40 }
 0x132   : > { %v1167_v10 = vsel %vm3100_vm2, %v1163_v62, %v1164_v26  ;;  %vm3113_vm2 = vmmov %vm3101_vm3 }
 0x133   : > { %v2860_v15 = vsel %vm1069_vm0, %v1051_v47, %v1085_v38  ;;  %v1888_v51 = vpack.c.bf16 %v1167_v10, %v1168_v20  ;;  %vm3112_vm0 = vnez %v3062_v43  ;;  %v1124_v63 = vsel %vm3113_vm2, %v1110_v13, %v1111_v41  ;;  %vm3114_vm1 = vmmov %vm3113_vm2 }
 0x134   : > { %v1117_v16 = vrot.slane %v2860_v15, 7  ;;  %v1165_v12 = vrot.slane %v2860_v15, 1  ;;  %v1125_v17 = vsel %vm3114_vm1, %v1109_v33, %v1110_v13  ;;  %v1112_v43 = vrot.slane %v2824_v5, 7 }
 0x135   : > { %2134 = vmatprep.mubr.msk.bf16.mxu0 %vm2618_vm6, %v1888_v51  ;;  %vm3105_vm6 = vmmov %vm3101_vm3  ;;  %v1848_v42 = vpack.c.bf16 %v1124_v63, %v1125_v17  ;;  %v1213_v58 = vpack.c.bf16 %v2860_v15, %v2852_v3  ;;  %v2957_v3 = vld [vmem:[%s3021_s4] ss:$0 sm:$0xff] }
 0x136   : > { %v1133_v1 = vsel %vm3102_vm14, %v1117_v16, %v1102_v18  ;;  %v1166_v44 = vsel %vm3103_vm12, %v1164_v26, %v1165_v12  ;;  %v1181_v21 = vsel %vm3104_vm5, %v1165_v12, %v1150_v2  ;;  %v1130_v61 = vsel %vm3105_vm6, %v1104_v25, %v1105_v52  ;;  %vm3116_vm14 = vmmov %vm3114_vm1  ;;  %v2195_v51 = vld [vmem:[%s2333_s14] sm:$0xff] }
 0x137   : > { %v1832_v7 = vpack.c.bf16 %v1132_v54, %v1133_v1  ;;  %v1892_v23 = vpack.c.bf16 %v1181_v21, %v1166_v44  ;;  %v1131_v2 = vsel %vm3106_vm11, %v1103_v6, %v1104_v25  ;;  %v1122_v31 = vsel %vm3116_vm14, %v1112_v43, %v1113_v53  ;;  %vm3117_vm12 = vmmov %vm3114_vm1  ;;  %v2199_v17 = vld [vmem:[%s2333_s14 + $0x20] sm:$0xff] }
 0x138   : > { %v1836_v27 = vpack.c.bf16 %v1130_v61, %v1131_v2  ;;  %v1123_v57 = vsel %vm3117_vm12, %v1111_v41, %v1112_v43  ;;  %vm3118_vm5 = vnez %v3082_v29  ;;  %vm3119_vm6 = vmmov %vm3114_vm1 }
 0x139   : > { %1833 = vmatmul.mubr.msk.bf16.vlgmr.msra.gmra.mxu1 %vm2401_vm13, %v1832_v7  ;;  %2135 = vmatmul.mubr.msk.bf16.gmra.mxu0 %vm2625_vm15, %v1892_v23  ;;  %vm3107_vm13 = vmmov %vm3101_vm3  ;;  %v1852_v35 = vpack.c.bf16 %v1122_v31, %v1123_v57  ;;  %v2196_v7 = vld [vmem:[%s2333_s14 + $0x8] sm:$0xff] }
 0x13a   : > { %1461 = vmatprep.mubr.bf16.mxu1 %v1207_v24  ;;  %v1128_v22 = vsel %vm3107_vm13, %v1106_v4, %v1107_v28  ;;  %vm3108_vm15 = vmmov %vm3101_vm3  ;;  %v2197_v28 = vld [vmem:[%s2333_s14 + $0x10] sm:$0xff] }
 0x13b   : > { %v1129_v0 = vsel %vm3108_vm15, %v1105_v52, %v1106_v4  ;;  %vm3120_vm11 = vmmov %vm3114_vm1 }
 0x13c   : > { %v1840_v30 = vpack.c.bf16 %v1128_v22, %v1129_v0  ;;  %vm3121_vm13 = vmmov %vm3114_vm1 }
 0x13d   : > { %v1118_v29 = vsel %vm3121_vm13, %v1116_v49, %v1117_v16  ;;  %vm3122_vm15 = vmmov %vm3114_vm1 }
 0x141   : > { %1837 = vmatmul.mubr.msk.bf16.gmra.mxu1 %vm2459_vm8, %v1836_v27  ;;  %vm3110_vm8 = vmmov %vm3101_vm3  ;;  %vm3115_vm3 = vnez %v3072_v14  ;;  %v1114_v14 = vrot.slane %v2838_v34, 7  ;;  %v1119_v34 = vsel %vm3122_vm15, %v1115_v46, %v1116_v49 }
 0x142   : > { %1469 = vmatprep.mubr.bf16.mxu1 %v1208_v19  ;;  %v1126_v32 = vsel %vm3110_vm8, %v1108_v40, %v1109_v33  ;;  %v1860_v59 = vpack.c.bf16 %v1118_v29, %v1119_v34  ;;  %v2198_v40 = vld [vmem:[%s2333_s14 + $0x18] sm:$0xff]  ;;  %v2201_v29 = vld [vmem:[%s2333_s14 + $0x30] sm:$0xff] }
 0x143   : > { %v1844_v37 = vpack.c.bf16 %v1126_v32, %v1127_v50  ;;  %v1120_v5 = vsel %vm3119_vm6, %v1114_v14, %v1115_v46  ;;  %v1121_v8 = vsel %vm3120_vm11, %v1113_v53, %v1114_v14  ;;  %v2200_v46 = vld [vmem:[%s2333_s14 + $0x28] sm:$0xff] }
 0x144   : > { %v1856_v56 = vpack.c.bf16 %v1120_v5, %v1121_v8 }
 0x149   : > { %1841 = vmatmul.mubr.msk.bf16.gmra.mxu1 %vm3109_vm9, %v1840_v30 }
 0x14a   : > { %1477 = vmatprep.mubr.bf16.mxu1 %v1209_v36 }
 0x151   : > { %1845 = vmatmul.mubr.msk.bf16.gmra.mxu1 %vm3112_vm0, %v1844_v37 }
 0x152   : > { %1485 = vmatprep.mubr.bf16.mxu1 %v1210_v9 }
 0x159   : > { %1849 = vmatmul.mubr.msk.bf16.gmra.mxu1 %vm3115_vm3, %v1848_v42 }
 0x15a   : > { %1493 = vmatprep.mubr.bf16.mxu1 %v1211_v45 }
 0x161   : > { %1853 = vmatmul.mubr.msk.bf16.gmra.mxu1 %vm3118_vm5, %v1852_v35 }
 0x162   : > { %1501 = vmatprep.mubr.bf16.mxu1 %v1212_v55 }
 0x169   : > { %1857 = vmatmul.mubr.msk.bf16.gmra.mxu1 %vm2657_vm10, %v1856_v56 }
 0x16a   : > { %1509 = vmatprep.mubr.bf16.mxu1 %v1213_v58 }
 0x171   : > { %1861 = vmatmul.mubr.msk.bf16.gmra.mxu1 %vm2671_vm7, %v1860_v59 }
 0x1cd   : > { %v2124_v60 = vpop.f32.mrf.mxu0 }
 0x1cf   : > { %v1552_v62 = vpop.f32.mrf.mxu0 }
 0x1d1   : > { %v2125_v6 = vpop.f32.mrf.mxu0 }
 0x1d3   : > { %v1555_v12 = vpop.f32.mrf.mxu0 }
 0x1dd   : > { %v2128_v24 = vpop.f32.mrf.mxu0 }
 0x1df   : > { %v1568_v22 = vpop.f32.mrf.mxu0 }
 0x1e1   : > { %v2129_v37 = vpop.f32.mrf.mxu0 }
 0x1e3   : > { %v1571_v45 = vpop.f32.mrf.mxu0 }
 0x1ed   : > { %v2132_v5 = vpop.f32.mrf.mxu0 }
 0x1f9   : > { %v2010_v39 = vpop.f32.mrf.mxu1 }
 0x1fb   : > { %v2011_v47 = vpop.f32.mrf.mxu1 }
 0x1fc   : > { %v2012_v26 = vadd.f32 %v2011_v47, %v2010_v39 }
 0x1fd   : > { %v2013_v38 = vpop.f32.mrf.mxu1 }
 0x1fe   : > { %v1456_v11 = vadd.f32 %v2012_v26, %v2957_v3 }
 0x1ff   : > { %v2014_v10 = vpop.f32.mrf.mxu1 }
 0x200   : > { %v1553_v20 = vadd.f32 %v1552_v62, %v1456_v11  ;;  %v2015_v48 = vadd.f32 %v2014_v10, %v2013_v38  ;;  %v2202_v38 = vld [vmem:[%s2333_s14 + $0x38] sm:$0xff] }
 0x201   : > { %v2016_v15 = vpop.f32.mrf.mxu1 }
 0x202   : > { %v1615_v18 = vadd.f32 %v2195_v51, %v1553_v20  ;;  %v1459_v16 = vadd.f32 %v2015_v48, %v2957_v3 }
 0x203   : > { %v2017_v54 = vpop.f32.mrf.mxu1 }
 0x204   : > { %1631 = vst [vmem:[%s2965_s16] sm:$0xff] %v1615_v18  ;;  %v1556_v1 = vadd.f32 %v1555_v12, %v1459_v16  ;;  %v2018_v44 = vadd.f32 %v2017_v54, %v2016_v15  ;;  %v2203_v18 = vld [vmem:[%s2333_s14 + $0x40] sm:$0xff] }
 0x205   : > { %v2019_v21 = vpop.f32.mrf.mxu1 }
 0x206   : > { %v1616_v23 = vadd.f32 %v2196_v7, %v1556_v1  ;;  %v1464_v52 = vadd.f32 %v2018_v44, %v2957_v3 }
 0x207   : > { %v2020_v25 = vpop.f32.mrf.mxu1 }
 0x208   : > { %1632 = vst [vmem:[%s2965_s16 + $0x8] sm:$0xff] %v1616_v23  ;;  %v1561_v61 = vadd.f32 %v2124_v60, %v1464_v52  ;;  %v2021_v2 = vadd.f32 %v2020_v25, %v2019_v21  ;;  %v1584_v60 = vpop.f32.mrf.mxu0  ;;  %v2204_v23 = vld [vmem:[%s2333_s14 + $0x48] sm:$0xff] }
 0x209   : > { %v2022_v27 = vpop.f32.mrf.mxu1 }
 0x20a   : > { %v1617_v19 = vadd.f32 %v2197_v28, %v1561_v61  ;;  %v1467_v4 = vadd.f32 %v2021_v2, %v2957_v3  ;;  %v2133_v10 = vpop.f32.mrf.mxu0 }
 0x20b   : > { %v2023_v0 = vpop.f32.mrf.mxu1 }
 0x20c   : > { %1633 = vst [vmem:[%s2965_s16 + $0x10] sm:$0xff] %v1617_v19  ;;  %v1564_v30 = vadd.f32 %v2125_v6, %v1467_v4  ;;  %v2024_v33 = vadd.f32 %v2023_v0, %v2022_v27  ;;  %v1587_v54 = vpop.f32.mrf.mxu0  ;;  %v2205_v19 = vld [vmem:[%s2333_s14 + $0x50] sm:$0xff] }
 0x20d   : > { %v2025_v36 = vpop.f32.mrf.mxu1 }
 0x20e   : > { %v1618_v32 = vadd.f32 %v2198_v40, %v1564_v30  ;;  %v1472_v50 = vadd.f32 %v2024_v33, %v2957_v3  ;;  %v2136_v25 = vpop.f32.mrf.mxu0 }
 0x20f   : > { %v2026_v41 = vpop.f32.mrf.mxu1 }
 0x210   : > { %1634 = vst [vmem:[%s2965_s16 + $0x18] sm:$0xff] %v1618_v32  ;;  %v1569_v9 = vadd.f32 %v1568_v22, %v1472_v50  ;;  %v2027_v13 = vadd.f32 %v2026_v41, %v2025_v36  ;;  %v1600_v0 = vpop.f32.mrf.mxu0  ;;  %v2206_v32 = vld [vmem:[%s2333_s14 + $0x58] sm:$0xff] }
 0x211   : > { %v2028_v63 = vpop.f32.mrf.mxu1 }
 0x212   : > { %v1619_v42 = vadd.f32 %v2199_v17, %v1569_v9  ;;  %v1475_v53 = vadd.f32 %v2027_v13, %v2957_v3  ;;  %v2137_v41 = vpop.f32.mrf.mxu0 }
 0x213   : > { %v2029_v43 = vpop.f32.mrf.mxu1 }
 0x214   : > { %1635 = vst [vmem:[%s2965_s16 + $0x20] sm:$0xff] %v1619_v42  ;;  %v1572_v31 = vadd.f32 %v1571_v45, %v1475_v53  ;;  %v2030_v57 = vadd.f32 %v2029_v43, %v2028_v63  ;;  %v2207_v42 = vld [vmem:[%s2333_s14 + $0x60] sm:$0xff]  ;;  %v1603_v43 = vpop.f32.mrf.mxu0 }
 0x215   : > { %v2031_v35 = vpop.f32.mrf.mxu1 }
 0x216   : > { %v1620_v55 = vadd.f32 %v2200_v46, %v1572_v31  ;;  %v1480_v14 = vadd.f32 %v2030_v57, %v2957_v3 }
 0x217   : > { %v2032_v8 = vpop.f32.mrf.mxu1 }
 0x218   : > { %1636 = vst [vmem:[%s2965_s16 + $0x28] sm:$0xff] %v1620_v55  ;;  %v1577_v56 = vadd.f32 %v2128_v24, %v1480_v14  ;;  %v2033_v58 = vadd.f32 %v2032_v8, %v2031_v35  ;;  %v2208_v55 = vld [vmem:[%s2333_s14 + $0x68] sm:$0xff] }
 0x219   : > { %v2034_v49 = vpop.f32.mrf.mxu1 }
 0x21a   : > { %v1621_v34 = vadd.f32 %v2201_v29, %v1577_v56  ;;  %v1483_v59 = vadd.f32 %v2033_v58, %v2957_v3 }
 0x21b   : > { %v2035_v39 = vpop.f32.mrf.mxu1 }
 0x21c   : > { %1637 = vst [vmem:[%s2965_s16 + $0x30] sm:$0xff] %v1621_v34  ;;  %v1580_v62 = vadd.f32 %v2129_v37, %v1483_v59  ;;  %v2036_v47 = vadd.f32 %v2035_v39, %v2034_v49  ;;  %v2209_v49 = vld [vmem:[%s2333_s14 + $0x70] sm:$0xff] }
 0x21d   : > { %v2037_v26 = vpop.f32.mrf.mxu1 }
 0x21e   : > { %v1622_v11 = vadd.f32 %v2202_v38, %v1580_v62  ;;  %v1488_v6 = vadd.f32 %v2036_v47, %v2957_v3 }
 0x21f   : > { %v2038_v20 = vpop.f32.mrf.mxu1 }
 0x220   : > { %1638 = vst [vmem:[%s2965_s16 + $0x38] sm:$0xff] %v1622_v11  ;;  %v1585_v48 = vadd.f32 %v1584_v60, %v1488_v6  ;;  %v2039_v15 = vadd.f32 %v2038_v20, %v2037_v26  ;;  %v2210_v60 = vld [vmem:[%s2333_s14 + $0x78] sm:$0xff] }
 0x221   : > { %v2040_v51 = vpop.f32.mrf.mxu1 }
 0x222   : > { %v1623_v16 = vadd.f32 %v2203_v18, %v1585_v48  ;;  %v1491_v12 = vadd.f32 %v2039_v15, %v2957_v3 }
 0x223   : > { %v2041_v1 = vpop.f32.mrf.mxu1 }
 0x224   : > { %1639 = vst [vmem:[%s2965_s16 + $0x40] sm:$0xff] %v1623_v16  ;;  %v1588_v44 = vadd.f32 %v1587_v54, %v1491_v12  ;;  %v2042_v21 = vadd.f32 %v2041_v1, %v2040_v51 }
 0x225   : > { %v2043_v7 = vpop.f32.mrf.mxu1 }
 0x226   : > { %v1624_v52 = vadd.f32 %v2204_v23, %v1588_v44  ;;  %v1496_v24 = vadd.f32 %v2042_v21, %v2957_v3 }
 0x227   : > { %v2044_v61 = vpop.f32.mrf.mxu1 }
 0x228   : > { %1640 = vst [vmem:[%s2965_s16 + $0x48] sm:$0xff] %v1624_v52  ;;  %v1593_v2 = vadd.f32 %v2132_v5, %v1496_v24  ;;  %v2045_v27 = vadd.f32 %v2044_v61, %v2043_v7 }
 0x229   : > { %v2046_v28 = vpop.f32.mrf.mxu1 }
 0x22a   : > { %v1625_v4 = vadd.f32 %v2205_v19, %v1593_v2  ;;  %v1499_v22 = vadd.f32 %v2045_v27, %v2957_v3 }
 0x22b   : > { %v2047_v30 = vpop.f32.mrf.mxu1 }
 0x22c   : > { %1641 = vst [vmem:[%s2965_s16 + $0x50] sm:$0xff] %v1625_v4  ;;  %v1596_v33 = vadd.f32 %v2133_v10, %v1499_v22  ;;  %v2048_v36 = vadd.f32 %v2047_v30, %v2046_v28 }
 0x22d   : > { %v2049_v40 = vpop.f32.mrf.mxu1 }
 0x22e   : > { %v1626_v50 = vadd.f32 %v2206_v32, %v1596_v33  ;;  %v1504_v37 = vadd.f32 %v2048_v36, %v2957_v3 }
 0x22f   : > { %v2050_v9 = vpop.f32.mrf.mxu1 }
 0x230   : > { %1642 = vst [vmem:[%s2965_s16 + $0x58] sm:$0xff] %v1626_v50  ;;  %v1601_v13 = vadd.f32 %v1600_v0, %v1504_v37  ;;  %v2051_v63 = vadd.f32 %v2050_v9, %v2049_v40 }
 0x231   : > { %v2052_v17 = vpop.f32.mrf.mxu1 }
 0x232   : > { %v1627_v53 = vadd.f32 %v2207_v42, %v1601_v13  ;;  %v1507_v45 = vadd.f32 %v2051_v63, %v2957_v3 }
 0x233   : > { %v2053_v31 = vpop.f32.mrf.mxu1 }
 0x234   : > { %1643 = vst [vmem:[%s2965_s16 + $0x60] sm:$0xff] %v1627_v53  ;;  %v1604_v57 = vadd.f32 %v1603_v43, %v1507_v45  ;;  %v2054_v35 = vadd.f32 %v2053_v31, %v2052_v17 }
 0x235   : > { %v2055_v46 = vpop.f32.mrf.mxu1 }
 0x236   : > { %v1628_v14 = vadd.f32 %v2208_v55, %v1604_v57  ;;  %v1512_v5 = vadd.f32 %v2054_v35, %v2957_v3 }
 0x237   : > { %v2056_v8 = vpop.f32.mrf.mxu1 }
 0x238   : > { %1644 = vst [vmem:[%s2965_s16 + $0x68] sm:$0xff] %v1628_v14  ;;  %v1609_v56 = vadd.f32 %v2136_v25, %v1512_v5  ;;  %v2057_v58 = vadd.f32 %v2056_v8, %v2055_v46 }
 0x23a   : > { %v1629_v29 = vadd.f32 %v2209_v49, %v1609_v56  ;;  %v1515_v34 = vadd.f32 %v2057_v58, %v2957_v3 }
 0x23c   : > { %1645 = vst [vmem:[%s2965_s16 + $0x70] sm:$0xff] %v1629_v29  ;;  %v1612_v59 = vadd.f32 %v2137_v41, %v1515_v34 }
 0x23e   : > { %v1630_v39 = vadd.f32 %v2210_v60, %v1612_v59 }
 0x240   : > { %1646 = vst [vmem:[%s2965_s16 + $0x78] sm:$0xff] %v1630_v39 }
 0x241 PF: > { %s15_s18 = sadd.s32 1, %s2217_s18  }
 0x242   : > { %p12_p4 = scmp.ge.s32.totalorder %s15_s18, 4  }
 0x244   :  { %14 = sbr.rel (!%p12_p4) target bundleno = 1 (0x1), region = 70 }

</bundles_post_ra>
